<compile_context>
chip_gen: v5e
topology: v5e:2x2
jax: 0.10.0
libtpu: 0.0.40
codegen_flags: <defaults>
</compile_context>

<pallas_src>
import jax
import jax.numpy as jnp
import numpy as np
from jax.experimental import pallas as pl
from jax.experimental.pallas import tpu as pltpu

DIM = 4            # data dimension
N_LAYERS = 2       # coupling-flow layers
H1, H2 = 32, 32    # hidden_dims of both MLPs

PARAM_ROWS = max(H1, H2, 2 * DIM, DIM)          # 32 (already a multiple of 8)


def _active_range(layer):
    """Compile-time 'ordered_{layer % 2}' mask: dims kept (mask==1) by this layer."""
    half = DIM // 2
    return (0, half) if layer % 2 == 0 else (half, DIM)


# ---------------------------------------------------------------------------
# Parameter slab layout: every (transposed, fused, mask-sliced) parameter is a
# column block of a single (PARAM_ROWS, PARAM_COLS) f32 slab.  MXU operands
# (width >= 8) get 128-lane-aligned column offsets.
# ---------------------------------------------------------------------------
def _param_entries():
    ents = []
    for l in range(N_LAYERS):
        ents += [
            (f"fW1_{l}",  H1, DIM // 2),   # active columns of W1 (transposed)
            (f"fW1t_{l}", H1, 1),
            (f"fb1_{l}",  H1, 1),
            (f"fW2_{l}",  H2, H1),
            (f"fb2_{l}",  H2, 1),
            (f"fW3_{l}",  2 * DIM, H2),    # fused [scale|shift] head
            (f"fb3_{l}",  2 * DIM, 1),
            (f"ftw_{l}",  2 * DIM, 1),     # fused time-embedding weights
        ]
    ents += [
        ("gW1w", H1, DIM),
        ("gW1t", H1, 1),
        ("gb1",  H1, 1),
        ("gW2",  H2, H1),
        ("gb2",  H2, 1),
        ("gW3",  DIM, H2),
        ("gb3",  DIM, 1),
    ]
    return ents


def _build_param_layout():
    offsets = {}
    c = 0
    for name, rows, width in _param_entries():
        if width >= 8:                       # MXU operand -> lane-align it
            c = ((c + 127) // 128) * 128
        offsets[name] = (c, width, rows)
        c += width
    c_pad = ((c + 127) // 128) * 128
    return offsets, c_pad


PARAM_OFFSETS, PARAM_COLS = _build_param_layout()


def pack_params(params):
    """Pack all module parameters into one (PARAM_ROWS, PARAM_COLS) f32 slab."""
    mats = {}
    for l in range(N_LAYERS):
        lo, hi = _active_range(l)
        mats[f"fW1_{l}"] = params["fW1x"][l][lo:hi, :].T          # (H1, D/2)
        mats[f"fW1t_{l}"] = params["fW1t"][l].T                   # (H1, 1)
        mats[f"fb1_{l}"] = params["fb1"][l].T                     # (H1, 1)
        mats[f"fW2_{l}"] = params["fW2"][l].T                     # (H2, H1)
        mats[f"fb2_{l}"] = params["fb2"][l].T                     # (H2, 1)
        mats[f"fW3_{l}"] = jnp.concatenate(
            [params["fW3a"][l], params["fW3b"][l]], axis=1).T     # (2D, H2)
        mats[f"fb3_{l}"] = jnp.concatenate(
            [params["fb3a"][l], params["fb3b"][l]], axis=1).T     # (2D, 1)
        mats[f"ftw_{l}"] = jnp.concatenate(
            [params["ftwa"][l], params["ftwb"][l]], axis=1).T     # (2D, 1)
    mats["gW1w"] = params["gW1w"].T                               # (H1, D)
    mats["gW1t"] = params["gW1t"].T
    mats["gb1"] = params["gb1"].T
    mats["gW2"] = params["gW2"].T
    mats["gb2"] = params["gb2"].T
    mats["gW3"] = params["gW3"].T                                 # (D, H2)
    mats["gb3"] = params["gb3"].T

    slab = jnp.zeros((PARAM_ROWS, PARAM_COLS), jnp.float32)
    for name, m in mats.items():
        c0, width, rows = PARAM_OFFSETS[name]
        assert m.shape == (rows, width), (name, m.shape, (rows, width))
        slab = slab.at[:rows, c0:c0 + width].set(m.astype(jnp.float32))
    return slab


# ---------------------------------------------------------------------------
# Kernel: everything is in the transposed layout (features on sublanes, the
# fused batch*time row axis on the 512-wide lane axis of each tile).
# ---------------------------------------------------------------------------
def _stochastic_flow2_kernel(in_ref, p_ref, out_ref):
    D = DIM
    x = in_ref[0:D, :]                   # (D,  TN)  state
    w = in_ref[D:2 * D, :]               # (D,  TN)  Wiener samples
    t = in_ref[2 * D:2 * D + 1, :]       # (1,  TN)  observation times

    def P(name):
        c0, width, rows = PARAM_OFFSETS[name]
        return p_ref[0:rows, c0:c0 + width]

    def first_layer(w_name, wt_name, b_name, inp):
        # tanh( cat([inp, t], -1) @ W1 + b1 )  as K broadcast-FMAs on the VPU
        # (K = 2 or 4: too small to be worth an MXU push).
        acc = P(b_name) + P(wt_name) * t                    # (H, TN)
        c0, width, rows = PARAM_OFFSETS[w_name]
        for k in range(width):
            col = p_ref[0:rows, c0 + k:c0 + k + 1]          # (H, 1)
            acc = acc + col * inp[k:k + 1, :]               # outer-product FMA
        return jnp.tanh(acc)

    row = jax.lax.broadcasted_iota(jnp.int32, (D, 1), 0)

    # ---- f: CouplingFlow = stack of ContinuousAffineCoupling layers --------
    for l in range(N_LAYERS):                  # static unroll over layers
        lo, hi = _active_range(l)              # compile-time mask pattern
        h = first_layer(f"fW1_{l}", f"fW1t_{l}", f"fb1_{l}", x[lo:hi, :])
        h = jnp.tanh(jnp.dot(P(f"fW2_{l}"), h,
                             preferred_element_type=jnp.float32) + P(f"fb2_{l}"))
        st = jnp.dot(P(f"fW3_{l}"), h,
                     preferred_element_type=jnp.float32) + P(f"fb3_{l}")   # (2D, TN)
        phi = jnp.tanh(P(f"ftw_{l}") * t)                                   # (2D, TN)
        scale, shift = st[0:D, :], st[D:2 * D, :]
        phi_s, phi_t = phi[0:D, :], phi[D:2 * D, :]
        upd = x * jnp.exp(scale * phi_s) + shift * phi_t
        keep = (row >= lo) & (row < hi)        # mask==1 rows pass through
        x = jnp.where(keep, x, upd)

    # ---- g: MLP on concat([w, t], -1) ---------------------------------------
    hg = first_layer("gW1w", "gW1t", "gb1", w)
    hg = jnp.tanh(jnp.dot(P("gW2"), hg,
                          preferred_element_type=jnp.float32) + P("gb2"))
    g_out = jnp.dot(P("gW3"), hg,
                    preferred_element_type=jnp.float32) + P("gb3")          # (D, TN)

    out_ref[...] = x + g_out


# ---------------------------------------------------------------------------
# Wrapper
# ---------------------------------------------------------------------------
def stochastic_flow2(x, t, w, params, *, tile_n=512):
    B, Sx, D = x.shape
    assert D == DIM
    T = t.shape[-2]
    if Sx == 1:                                # torch repeat_interleave over time
        x = jnp.broadcast_to(x, (B, T, D))
    N = B * T

    # Lane-align and tile the fused row axis (rows live on the lane axis).
    n_lane = ((N + 127) // 128) * 128
    tn = max(128, min(tile_n, n_lane))
    n_pad = ((n_lane + tn - 1) // tn) * tn

    # One packed, transposed input slab: rows [x ; w ; t] -> (2D+1, N).
    xT = x.reshape(N, D).astype(jnp.float32).T
    wT = w.reshape(N, D).astype(jnp.float32).T
    tT = t.reshape(N, 1).astype(jnp.float32).T
    slab = jnp.concatenate([xT, wT, tT], axis=0)
    slab = jnp.pad(slab, ((0, 0), (0, n_pad - N)))

    pslab = pack_params(params)                # (PARAM_ROWS, PARAM_COLS)

    grid = (n_pad // tn,)
    out = pl.pallas_call(
        _stochastic_flow2_kernel,
        out_shape=jax.ShapeDtypeStruct((D, n_pad), jnp.float32),
        grid=grid,
        in_specs=[
            pl.BlockSpec((2 * D + 1, tn), lambda i: (0, i)),
            pl.BlockSpec((PARAM_ROWS, PARAM_COLS), lambda i: (0, 0)),
        ],
        out_specs=pl.BlockSpec((D, tn), lambda i: (0, i)),
        compiler_params=pltpu.CompilerParams(dimension_semantics=("parallel",)),
    )(slab, pslab)

    return out[:, :N].T.reshape(B, T, D)


# ---------------------------------------------------------------------------
# Parameter init + plain-JAX reference (for verification)
# ---------------------------------------------------------------------------
def init_params(key):
    keys = jax.random.split(key, 18)
    L, D = N_LAYERS, DIM

    def nrm(k, shape, s=0.1):
        return jax.random.normal(k, shape, jnp.float32) * s

    return dict(
        fW1x=nrm(keys[0], (L, D, H1)),
        fW1t=nrm(keys[1], (L, 1, H1)),
        fb1=nrm(keys[2], (L, 1, H1)),
        fW2=nrm(keys[3], (L, H1, H2)),
        fb2=nrm(keys[4], (L, 1, H2)),
        fW3a=nrm(keys[5], (L, H2, D)),
        fb3a=nrm(keys[6], (L, 1, D)),
        fW3b=nrm(keys[7], (L, H2, D)),
        fb3b=nrm(keys[8], (L, 1, D)),
        ftwa=nrm(keys[9], (L, 1, D), 1.0),
        ftwb=nrm(keys[10], (L, 1, D), 1.0),
        gW1w=nrm(keys[11], (D, H1)),
        gW1t=nrm(keys[12], (1, H1)),
        gb1=nrm(keys[13], (1, H1)),
        gW2=nrm(keys[14], (H1, H2)),
        gb2=nrm(keys[15], (1, H2)),
        gW3=nrm(keys[16], (H2, D)),
        gb3=nrm(keys[17], (1, D)),
    )


def reference(x, t, w, params):
    """Plain-JAX reference of the same math (forced to full f32 matmuls)."""
    with jax.default_matmul_precision("float32"):
        B, Sx, D = x.shape
        T = t.shape[-2]
        if Sx == 1:
            x = jnp.broadcast_to(x, (B, T, D))
        for l in range(N_LAYERS):
            lo, hi = _active_range(l)
            mask = jnp.zeros((D,), jnp.float32).at[lo:hi].set(1.0)
            xm = x * mask
            h = jnp.tanh(xm @ params["fW1x"][l] + t * params["fW1t"][l] + params["fb1"][l])
            h = jnp.tanh(h @ params["fW2"][l] + params["fb2"][l])
            scale = h @ params["fW3a"][l] + params["fb3a"][l]
            shift = h @ params["fW3b"][l] + params["fb3b"][l]
            phi_s = jnp.tanh(t * params["ftwa"][l])
            phi_t = jnp.tanh(t * params["ftwb"][l])
            x = xm + (1.0 - mask) * (x * jnp.exp(scale * phi_s) + shift * phi_t)
        h = jnp.tanh(w @ params["gW1w"] + t * params["gW1t"] + params["gb1"])
        h = jnp.tanh(h @ params["gW2"] + params["gb2"])
        g = h @ params["gW3"] + params["gb3"]
        return x + g


if __name__ == "__main__":
    key = jax.random.PRNGKey(0)
    kx, kt, kw, kp = jax.random.split(key, 4)
    B, T = 4, 256                                             # N = 1024 rows -> grid of 2
    x = jax.random.normal(kx, (B, 1, DIM), jnp.float32)       # initial state, repeated over T
    t = jax.random.uniform(kt, (B, T, 1), jnp.float32)        # observation times
    w = jax.random.normal(kw, (B, T, DIM), jnp.float32)       # Wiener-process samples
    params = init_params(kp)

    out = stochastic_flow2(x, t, w, params, tile_n=512)
    out = jax.block_until_ready(out)

    ref = reference(x, t, w, params)
    # Tolerance covers accumulation-order differences of the transposed matmuls.
    np.testing.assert_allclose(np.asarray(out), np.asarray(ref), rtol=1e-3, atol=1e-3)
    print("KERNEL_OK")
</pallas_src>

<mosaic_0001>
module attributes {stable_mosaic.version = 11 : i64} {
  func.func @_stochastic_flow2_kernel(%arg0: i32, %arg1: memref<9x512xf32, #tpu.memory_space<vmem>>, %arg2: memref<32x896xf32, #tpu.memory_space<vmem>>, %arg3: memref<4x512xf32, #tpu.memory_space<vmem>>) attributes {dimension_semantics = [#tpu.dimension_semantics<parallel>], iteration_bounds = array<i64: 2>, scalar_prefetch = 0 : i64, scratch_operands = 0 : i64, tpu.core_type = #tpu.core_type<tc>, window_params = [{transform_indices = @transform_0, window_bounds = array<i64: 9, 512>}, {pipeline_mode = #tpu.pipeline_mode<synchronous>, transform_indices = @transform_1, window_bounds = array<i64: 32, 896>}, {transform_indices = @transform_2, window_bounds = array<i64: 4, 512>}]} {
    %c0 = arith.constant 0 : index
    %c0_0 = arith.constant 0 : index
    %0 = vector.load %arg1[%c0, %c0_0] : memref<9x512xf32, #tpu.memory_space<vmem>>, vector<4x512xf32>
    %c4 = arith.constant 4 : index
    %c0_1 = arith.constant 0 : index
    %1 = vector.load %arg1[%c4, %c0_1] : memref<9x512xf32, #tpu.memory_space<vmem>>, vector<4x512xf32>
    %c8 = arith.constant 8 : index
    %c0_2 = arith.constant 0 : index
    %2 = vector.load %arg1[%c8, %c0_2] : memref<9x512xf32, #tpu.memory_space<vmem>>, vector<1x512xf32>
    %3 = tpu.iota {dimensions = array<i32: 0>} : vector<4x1xi32>
    %4 = vector.extract_strided_slice %0 {offsets = [0, 0], sizes = [2, 512], strides = [1, 1]} : vector<4x512xf32> to vector<2x512xf32>
    %c0_3 = arith.constant 0 : index
    %c3 = arith.constant 3 : index
    %5 = vector.load %arg2[%c0_3, %c3] : memref<32x896xf32, #tpu.memory_space<vmem>>, vector<32x1xf32>
    %c0_4 = arith.constant 0 : index
    %c2 = arith.constant 2 : index
    %6 = vector.load %arg2[%c0_4, %c2] : memref<32x896xf32, #tpu.memory_space<vmem>>, vector<32x1xf32>
    %7 = vector.broadcast %6 : vector<32x1xf32> to vector<32x512xf32>
    %8 = vector.broadcast %2 : vector<1x512xf32> to vector<32x512xf32>
    %9 = arith.mulf %7, %8 : vector<32x512xf32>
    %10 = vector.broadcast %5 : vector<32x1xf32> to vector<32x512xf32>
    %11 = arith.addf %10, %9 : vector<32x512xf32>
    %c0_5 = arith.constant 0 : index
    %c0_6 = arith.constant 0 : index
    %12 = vector.load %arg2[%c0_5, %c0_6] : memref<32x896xf32, #tpu.memory_space<vmem>>, vector<32x1xf32>
    %13 = vector.extract_strided_slice %4 {offsets = [0, 0], sizes = [1, 512], strides = [1, 1]} : vector<2x512xf32> to vector<1x512xf32>
    %14 = vector.broadcast %12 : vector<32x1xf32> to vector<32x512xf32>
    %15 = vector.broadcast %13 : vector<1x512xf32> to vector<32x512xf32>
    %16 = arith.mulf %14, %15 : vector<32x512xf32>
    %17 = arith.addf %11, %16 : vector<32x512xf32>
    %c0_7 = arith.constant 0 : index
    %c1 = arith.constant 1 : index
    %18 = vector.load %arg2[%c0_7, %c1] : memref<32x896xf32, #tpu.memory_space<vmem>>, vector<32x1xf32>
    %19 = vector.extract_strided_slice %4 {offsets = [1, 0], sizes = [1, 512], strides = [1, 1]} : vector<2x512xf32> to vector<1x512xf32>
    %20 = vector.broadcast %18 : vector<32x1xf32> to vector<32x512xf32>
    %21 = vector.broadcast %19 : vector<1x512xf32> to vector<32x512xf32>
    %22 = arith.mulf %20, %21 : vector<32x512xf32>
    %23 = arith.addf %17, %22 : vector<32x512xf32>
    %24 = math.tanh %23 : vector<32x512xf32>
    %c0_8 = arith.constant 0 : index
    %c128 = arith.constant 128 : index
    %25 = vector.load %arg2[%c0_8, %c128] : memref<32x896xf32, #tpu.memory_space<vmem>>, vector<32x32xf32>
    %cst = arith.constant dense<0.000000e+00> : vector<32x512xf32>
    %26 = tpu.matmul %25, %24, %cst {dimension_numbers = #tpu.dot_dimension_numbers<[1], [0], [0], [1], [0, 0, 1, 1], [], []>} : vector<32x32xf32>, vector<32x512xf32>, vector<32x512xf32> -> vector<32x512xf32>
    %c0_9 = arith.constant 0 : index
    %c160 = arith.constant 160 : index
    %27 = vector.load %arg2[%c0_9, %c160] : memref<32x896xf32, #tpu.memory_space<vmem>>, vector<32x1xf32>
    %28 = vector.broadcast %27 : vector<32x1xf32> to vector<32x512xf32>
    %29 = arith.addf %26, %28 : vector<32x512xf32>
    %30 = math.tanh %29 : vector<32x512xf32>
    %c0_10 = arith.constant 0 : index
    %c256 = arith.constant 256 : index
    %31 = vector.load %arg2[%c0_10, %c256] : memref<32x896xf32, #tpu.memory_space<vmem>>, vector<8x32xf32>
    %cst_11 = arith.constant dense<0.000000e+00> : vector<8x512xf32>
    %32 = tpu.matmul %31, %30, %cst_11 {dimension_numbers = #tpu.dot_dimension_numbers<[1], [0], [0], [1], [0, 0, 1, 1], [], []>} : vector<8x32xf32>, vector<32x512xf32>, vector<8x512xf32> -> vector<8x512xf32>
    %c0_12 = arith.constant 0 : index
    %c288 = arith.constant 288 : index
    %33 = vector.load %arg2[%c0_12, %c288] : memref<32x896xf32, #tpu.memory_space<vmem>>, vector<8x1xf32>
    %34 = vector.broadcast %33 : vector<8x1xf32> to vector<8x512xf32>
    %35 = arith.addf %32, %34 : vector<8x512xf32>
    %c0_13 = arith.constant 0 : index
    %c289 = arith.constant 289 : index
    %36 = vector.load %arg2[%c0_13, %c289] : memref<32x896xf32, #tpu.memory_space<vmem>>, vector<8x1xf32>
    %37 = vector.broadcast %36 : vector<8x1xf32> to vector<8x512xf32>
    %38 = vector.broadcast %2 : vector<1x512xf32> to vector<8x512xf32>
    %39 = arith.mulf %37, %38 : vector<8x512xf32>
    %40 = math.tanh %39 : vector<8x512xf32>
    %41 = vector.extract_strided_slice %35 {offsets = [0, 0], sizes = [4, 512], strides = [1, 1]} : vector<8x512xf32> to vector<4x512xf32>
    %42 = vector.extract_strided_slice %35 {offsets = [4, 0], sizes = [4, 512], strides = [1, 1]} : vector<8x512xf32> to vector<4x512xf32>
    %43 = vector.extract_strided_slice %40 {offsets = [0, 0], sizes = [4, 512], strides = [1, 1]} : vector<8x512xf32> to vector<4x512xf32>
    %44 = vector.extract_strided_slice %40 {offsets = [4, 0], sizes = [4, 512], strides = [1, 1]} : vector<8x512xf32> to vector<4x512xf32>
    %45 = arith.mulf %41, %43 : vector<4x512xf32>
    %46 = math.exp %45 : vector<4x512xf32>
    %47 = arith.mulf %0, %46 : vector<4x512xf32>
    %48 = arith.mulf %42, %44 : vector<4x512xf32>
    %49 = arith.addf %47, %48 : vector<4x512xf32>
    %c0_i32 = arith.constant 0 : i32
    %50 = vector.broadcast %c0_i32 : i32 to vector<4x1xi32>
    %51 = arith.cmpi sge, %3, %50 : vector<4x1xi32>
    %c2_i32 = arith.constant 2 : i32
    %52 = vector.broadcast %c2_i32 : i32 to vector<4x1xi32>
    %53 = arith.cmpi slt, %3, %52 : vector<4x1xi32>
    %54 = arith.andi %51, %53 : vector<4x1xi1>
    %55 = vector.shape_cast %54 : vector<4x1xi1> to vector<4x1xi1>
    %56 = vector.broadcast %55 : vector<4x1xi1> to vector<4x512xi1>
    %57 = arith.select %56, %0, %49 : vector<4x512xi1>, vector<4x512xf32>
    %58 = vector.extract_strided_slice %57 {offsets = [2, 0], sizes = [2, 512], strides = [1, 1]} : vector<4x512xf32> to vector<2x512xf32>
    %c0_14 = arith.constant 0 : index
    %c293 = arith.constant 293 : index
    %59 = vector.load %arg2[%c0_14, %c293] : memref<32x896xf32, #tpu.memory_space<vmem>>, vector<32x1xf32>
    %c0_15 = arith.constant 0 : index
    %c292 = arith.constant 292 : index
    %60 = vector.load %arg2[%c0_15, %c292] : memref<32x896xf32, #tpu.memory_space<vmem>>, vector<32x1xf32>
    %61 = vector.broadcast %60 : vector<32x1xf32> to vector<32x512xf32>
    %62 = vector.broadcast %2 : vector<1x512xf32> to vector<32x512xf32>
    %63 = arith.mulf %61, %62 : vector<32x512xf32>
    %64 = vector.broadcast %59 : vector<32x1xf32> to vector<32x512xf32>
    %65 = arith.addf %64, %63 : vector<32x512xf32>
    %c0_16 = arith.constant 0 : index
    %c290 = arith.constant 290 : index
    %66 = vector.load %arg2[%c0_16, %c290] : memref<32x896xf32, #tpu.memory_space<vmem>>, vector<32x1xf32>
    %67 = vector.extract_strided_slice %58 {offsets = [0, 0], sizes = [1, 512], strides = [1, 1]} : vector<2x512xf32> to vector<1x512xf32>
    %68 = vector.broadcast %66 : vector<32x1xf32> to vector<32x512xf32>
    %69 = vector.broadcast %67 : vector<1x512xf32> to vector<32x512xf32>
    %70 = arith.mulf %68, %69 : vector<32x512xf32>
    %71 = arith.addf %65, %70 : vector<32x512xf32>
    %c0_17 = arith.constant 0 : index
    %c291 = arith.constant 291 : index
    %72 = vector.load %arg2[%c0_17, %c291] : memref<32x896xf32, #tpu.memory_space<vmem>>, vector<32x1xf32>
    %73 = vector.extract_strided_slice %58 {offsets = [1, 0], sizes = [1, 512], strides = [1, 1]} : vector<2x512xf32> to vector<1x512xf32>
    %74 = vector.broadcast %72 : vector<32x1xf32> to vector<32x512xf32>
    %75 = vector.broadcast %73 : vector<1x512xf32> to vector<32x512xf32>
    %76 = arith.mulf %74, %75 : vector<32x512xf32>
    %77 = arith.addf %71, %76 : vector<32x512xf32>
    %78 = math.tanh %77 : vector<32x512xf32>
    %c0_18 = arith.constant 0 : index
    %c384 = arith.constant 384 : index
    %79 = vector.load %arg2[%c0_18, %c384] : memref<32x896xf32, #tpu.memory_space<vmem>>, vector<32x32xf32>
    %cst_19 = arith.constant dense<0.000000e+00> : vector<32x512xf32>
    %80 = tpu.matmul %79, %78, %cst_19 {dimension_numbers = #tpu.dot_dimension_numbers<[1], [0], [0], [1], [0, 0, 1, 1], [], []>} : vector<32x32xf32>, vector<32x512xf32>, vector<32x512xf32> -> vector<32x512xf32>
    %c0_20 = arith.constant 0 : index
    %c416 = arith.constant 416 : index
    %81 = vector.load %arg2[%c0_20, %c416] : memref<32x896xf32, #tpu.memory_space<vmem>>, vector<32x1xf32>
    %82 = vector.broadcast %81 : vector<32x1xf32> to vector<32x512xf32>
    %83 = arith.addf %80, %82 : vector<32x512xf32>
    %84 = math.tanh %83 : vector<32x512xf32>
    %c0_21 = arith.constant 0 : index
    %c512 = arith.constant 512 : index
    %85 = vector.load %arg2[%c0_21, %c512] : memref<32x896xf32, #tpu.memory_space<vmem>>, vector<8x32xf32>
    %cst_22 = arith.constant dense<0.000000e+00> : vector<8x512xf32>
    %86 = tpu.matmul %85, %84, %cst_22 {dimension_numbers = #tpu.dot_dimension_numbers<[1], [0], [0], [1], [0, 0, 1, 1], [], []>} : vector<8x32xf32>, vector<32x512xf32>, vector<8x512xf32> -> vector<8x512xf32>
    %c0_23 = arith.constant 0 : index
    %c544 = arith.constant 544 : index
    %87 = vector.load %arg2[%c0_23, %c544] : memref<32x896xf32, #tpu.memory_space<vmem>>, vector<8x1xf32>
    %88 = vector.broadcast %87 : vector<8x1xf32> to vector<8x512xf32>
    %89 = arith.addf %86, %88 : vector<8x512xf32>
    %c0_24 = arith.constant 0 : index
    %c545 = arith.constant 545 : index
    %90 = vector.load %arg2[%c0_24, %c545] : memref<32x896xf32, #tpu.memory_space<vmem>>, vector<8x1xf32>
    %91 = vector.broadcast %90 : vector<8x1xf32> to vector<8x512xf32>
    %92 = vector.broadcast %2 : vector<1x512xf32> to vector<8x512xf32>
    %93 = arith.mulf %91, %92 : vector<8x512xf32>
    %94 = math.tanh %93 : vector<8x512xf32>
    %95 = vector.extract_strided_slice %89 {offsets = [0, 0], sizes = [4, 512], strides = [1, 1]} : vector<8x512xf32> to vector<4x512xf32>
    %96 = vector.extract_strided_slice %89 {offsets = [4, 0], sizes = [4, 512], strides = [1, 1]} : vector<8x512xf32> to vector<4x512xf32>
    %97 = vector.extract_strided_slice %94 {offsets = [0, 0], sizes = [4, 512], strides = [1, 1]} : vector<8x512xf32> to vector<4x512xf32>
    %98 = vector.extract_strided_slice %94 {offsets = [4, 0], sizes = [4, 512], strides = [1, 1]} : vector<8x512xf32> to vector<4x512xf32>
    %99 = arith.mulf %95, %97 : vector<4x512xf32>
    %100 = math.exp %99 : vector<4x512xf32>
    %101 = arith.mulf %57, %100 : vector<4x512xf32>
    %102 = arith.mulf %96, %98 : vector<4x512xf32>
    %103 = arith.addf %101, %102 : vector<4x512xf32>
    %c2_i32_25 = arith.constant 2 : i32
    %104 = vector.broadcast %c2_i32_25 : i32 to vector<4x1xi32>
    %105 = arith.cmpi sge, %3, %104 : vector<4x1xi32>
    %c4_i32 = arith.constant 4 : i32
    %106 = vector.broadcast %c4_i32 : i32 to vector<4x1xi32>
    %107 = arith.cmpi slt, %3, %106 : vector<4x1xi32>
    %108 = arith.andi %105, %107 : vector<4x1xi1>
    %109 = vector.shape_cast %108 : vector<4x1xi1> to vector<4x1xi1>
    %110 = vector.broadcast %109 : vector<4x1xi1> to vector<4x512xi1>
    %111 = arith.select %110, %57, %103 : vector<4x512xi1>, vector<4x512xf32>
    %c0_26 = arith.constant 0 : index
    %c551 = arith.constant 551 : index
    %112 = vector.load %arg2[%c0_26, %c551] : memref<32x896xf32, #tpu.memory_space<vmem>>, vector<32x1xf32>
    %c0_27 = arith.constant 0 : index
    %c550 = arith.constant 550 : index
    %113 = vector.load %arg2[%c0_27, %c550] : memref<32x896xf32, #tpu.memory_space<vmem>>, vector<32x1xf32>
    %114 = vector.broadcast %113 : vector<32x1xf32> to vector<32x512xf32>
    %115 = vector.broadcast %2 : vector<1x512xf32> to vector<32x512xf32>
    %116 = arith.mulf %114, %115 : vector<32x512xf32>
    %117 = vector.broadcast %112 : vector<32x1xf32> to vector<32x512xf32>
    %118 = arith.addf %117, %116 : vector<32x512xf32>
    %c0_28 = arith.constant 0 : index
    %c546 = arith.constant 546 : index
    %119 = vector.load %arg2[%c0_28, %c546] : memref<32x896xf32, #tpu.memory_space<vmem>>, vector<32x1xf32>
    %120 = vector.extract_strided_slice %1 {offsets = [0, 0], sizes = [1, 512], strides = [1, 1]} : vector<4x512xf32> to vector<1x512xf32>
    %121 = vector.broadcast %119 : vector<32x1xf32> to vector<32x512xf32>
    %122 = vector.broadcast %120 : vector<1x512xf32> to vector<32x512xf32>
    %123 = arith.mulf %121, %122 : vector<32x512xf32>
    %124 = arith.addf %118, %123 : vector<32x512xf32>
    %c0_29 = arith.constant 0 : index
    %c547 = arith.constant 547 : index
    %125 = vector.load %arg2[%c0_29, %c547] : memref<32x896xf32, #tpu.memory_space<vmem>>, vector<32x1xf32>
    %126 = vector.extract_strided_slice %1 {offsets = [1, 0], sizes = [1, 512], strides = [1, 1]} : vector<4x512xf32> to vector<1x512xf32>
    %127 = vector.broadcast %125 : vector<32x1xf32> to vector<32x512xf32>
    %128 = vector.broadcast %126 : vector<1x512xf32> to vector<32x512xf32>
    %129 = arith.mulf %127, %128 : vector<32x512xf32>
    %130 = arith.addf %124, %129 : vector<32x512xf32>
    %c0_30 = arith.constant 0 : index
    %c548 = arith.constant 548 : index
    %131 = vector.load %arg2[%c0_30, %c548] : memref<32x896xf32, #tpu.memory_space<vmem>>, vector<32x1xf32>
    %132 = vector.extract_strided_slice %1 {offsets = [2, 0], sizes = [1, 512], strides = [1, 1]} : vector<4x512xf32> to vector<1x512xf32>
    %133 = vector.broadcast %131 : vector<32x1xf32> to vector<32x512xf32>
    %134 = vector.broadcast %132 : vector<1x512xf32> to vector<32x512xf32>
    %135 = arith.mulf %133, %134 : vector<32x512xf32>
    %136 = arith.addf %130, %135 : vector<32x512xf32>
    %c0_31 = arith.constant 0 : index
    %c549 = arith.constant 549 : index
    %137 = vector.load %arg2[%c0_31, %c549] : memref<32x896xf32, #tpu.memory_space<vmem>>, vector<32x1xf32>
    %138 = vector.extract_strided_slice %1 {offsets = [3, 0], sizes = [1, 512], strides = [1, 1]} : vector<4x512xf32> to vector<1x512xf32>
    %139 = vector.broadcast %137 : vector<32x1xf32> to vector<32x512xf32>
    %140 = vector.broadcast %138 : vector<1x512xf32> to vector<32x512xf32>
    %141 = arith.mulf %139, %140 : vector<32x512xf32>
    %142 = arith.addf %136, %141 : vector<32x512xf32>
    %143 = math.tanh %142 : vector<32x512xf32>
    %c0_32 = arith.constant 0 : index
    %c640 = arith.constant 640 : index
    %144 = vector.load %arg2[%c0_32, %c640] : memref<32x896xf32, #tpu.memory_space<vmem>>, vector<32x32xf32>
    %cst_33 = arith.constant dense<0.000000e+00> : vector<32x512xf32>
    %145 = tpu.matmul %144, %143, %cst_33 {dimension_numbers = #tpu.dot_dimension_numbers<[1], [0], [0], [1], [0, 0, 1, 1], [], []>} : vector<32x32xf32>, vector<32x512xf32>, vector<32x512xf32> -> vector<32x512xf32>
    %c0_34 = arith.constant 0 : index
    %c672 = arith.constant 672 : index
    %146 = vector.load %arg2[%c0_34, %c672] : memref<32x896xf32, #tpu.memory_space<vmem>>, vector<32x1xf32>
    %147 = vector.broadcast %146 : vector<32x1xf32> to vector<32x512xf32>
    %148 = arith.addf %145, %147 : vector<32x512xf32>
    %149 = math.tanh %148 : vector<32x512xf32>
    %c0_35 = arith.constant 0 : index
    %c768 = arith.constant 768 : index
    %150 = vector.load %arg2[%c0_35, %c768] : memref<32x896xf32, #tpu.memory_space<vmem>>, vector<4x32xf32>
    %cst_36 = arith.constant dense<0.000000e+00> : vector<4x512xf32>
    %151 = tpu.matmul %150, %149, %cst_36 {dimension_numbers = #tpu.dot_dimension_numbers<[1], [0], [0], [1], [0, 0, 1, 1], [], []>} : vector<4x32xf32>, vector<32x512xf32>, vector<4x512xf32> -> vector<4x512xf32>
    %c0_37 = arith.constant 0 : index
    %c800 = arith.constant 800 : index
    %152 = vector.load %arg2[%c0_37, %c800] : memref<32x896xf32, #tpu.memory_space<vmem>>, vector<4x1xf32>
    %153 = vector.broadcast %152 : vector<4x1xf32> to vector<4x512xf32>
    %154 = arith.addf %151, %153 : vector<4x512xf32>
    %155 = arith.addf %111, %154 : vector<4x512xf32>
    %c0_38 = arith.constant 0 : index
    %c0_39 = arith.constant 0 : index
    %156 = vector.load %arg3[%c0_38, %c0_39] : memref<4x512xf32, #tpu.memory_space<vmem>>, vector<4x512xf32>
    tpu.vector_store %arg3[%c0_38, %c0_39], %155 {strides = array<i32>} : memref<4x512xf32, #tpu.memory_space<vmem>>, vector<4x512xf32>,
    return
  }
  func.func @transform_0(%arg0: i32) -> (i32, i32) {
    %c0_i32 = arith.constant 0 : i32
    %c0_i32_0 = arith.constant 0 : i32
    return %c0_i32, %arg0 : i32, i32
  }
  func.func @transform_1(%arg0: i32) -> (i32, i32) {
    %c0_i32 = arith.constant 0 : i32
    %c0_i32_0 = arith.constant 0 : i32
    %c0_i32_1 = arith.constant 0 : i32
    return %c0_i32, %c0_i32_0 : i32, i32
  }
  func.func @transform_2(%arg0: i32) -> (i32, i32) {
    %c0_i32 = arith.constant 0 : i32
    %c0_i32_0 = arith.constant 0 : i32
    return %c0_i32, %arg0 : i32, i32
  }
}

</mosaic_0001>

<bundles_post_ra>
// kernel: tpu_custom_call.1
= control target key start
LH: loop header
LB: loop body
LE: loop exit
PB: predicated region body
PF: predicated region fallthrough
CT: control target
= control target key end

     0   :  { %7 = vsyncpa [#allocation3], 0  ;;  %s3548_s0 = inlined_call_operand.hbm [shape: f32[9,1024], index: 0, kind: input, shape index: {}]   ;;  %s3549_s1 = inlined_call_operand.hbm [shape: f32[32,896], index: 1, kind: input, shape index: {}]   ;;  %s3550_s2 = inlined_call_operand.hbm [shape: f32[4,1024], index: 2, kind: output, shape index: {}]  }
   0x1   :  { %9 = vsyncpa [#allocation3 + $0x1], 0 }
   0x2   :  { %10 = vsyncpa [#allocation6], 0 }
   0x3   :  { %11 = vsyncpa [#allocation4], 0 }
   0x4   :  { %13 = vsyncpa [#allocation4 + $0x1], 0  ;;  %s2460_s9 = smov 0   ;;  %s2462_s10 = smov 0  }
   0x5   :  { %s2464_s11 = smov 0   ;;  %s2466_s12 = smov 0  }
   0x6 LB: > { %s2481_s13 = sadd.s32 4294967295, %s2425_s12   ;;  %s1861_s14 = sadd.s32 4294967294, %s2425_s12   ;;  %s2425_s12 = sphi %s2466_s12, %s3621_s12   ;;  %s2421_s11 = sphi %s2464_s11, %s3620_s11   ;;  %s2417_s10 = sphi %s2462_s10, %s3619_s10   ;;  %s2413_s9 = sphi %s2460_s9, %s3618_s9  }
   0x7   : > { %p39_p0 = scmp.ne.s32.totalorder %s2417_s10, %s2413_s9  ;;  %p40_p1 = scmp.eq.s32.totalorder %s2481_s13, 0 }
   0x8   : > { %p84_p2 = scmp.eq.s32.totalorder %s2481_s13, 1  ;;  %p90_p3 = scmp.eq.s32.totalorder %s1861_s14, 1 }
   0x9   : > { %p2490_p4 = por %p40_p1, %p39_p0  ;;  %p1862_p5 = scmp.ge.s32.totalorder %s2425_s12, 1 }
   0xa   : > { %p2495_p6 = por %p90_p3, %p39_p0  ;;  %p97_p7 = scmp.lt.s32.totalorder %s2425_s12, 3 }
   0xb   : > { %s108_s19 = sshll.u32 %s3549_s1, 4  ;;  %s2427_s21 = smov [#allocation5]   ;;  %s109_s19 = int_to_ptr.hbm [resolvable:$true] %s108_s19 }
   0xc   : > { %p2503_p8 = pnand %p1862_p5, %p97_p7  ;;  %s110_s22 = sshll.u32 %s2427_s21, 4  ;;  %s111_s22 = int_to_ptr.vmem [resolvable:$true] %s110_s22 }
   0xd   : > { %s2513_s23 = sadd.s32 1, %s2425_s12   ;;  %s2428_s24 = smov 896  }
   0xe   : > { %p1948_p9 = pneg %p2503_p8  ;;  %s2429_s25 = smov 56  }
   0xf   : > { %s23_s26 = ssub.s32 %s2425_s12, %s2513_s23  ;;  %s26_s27 = sadd.s32 1, %s2421_s11 }
  0x10   : > { %p1949_p10 = pnand %p1948_p9, %p40_p1  ;;  %p24_p12 = scmp.eq.s32.totalorder %s23_s26, 0 }
  0x11   : > { %p33_p13 = scmp.ne.s32.totalorder %s2421_s11, %s2417_s10  ;;  %p34_p0 = scmp.eq.s32.totalorder %s2425_s12, 0 }
  0x12   : > { %1951 = dma.hbm_to_vmem [thread:$0]  (!%p1949_p10), %s109_s19, 3584, %s111_s22, [#allocation6], %s2428_s24, %s2428_s24, %s2429_s25  }
  0x13   : > { %p1961_p3 = scmp.lt.s32.totalorder %s2425_s12, 2  ;;  %p35_p5 = por %p34_p0, %p33_p13 }
  0x14   : > { %s2523_s28 = scalar_select %p24_p12, %s2421_s11, %s26_s27  }
  0x15   : > { %p2527_p7 = por %p84_p2, %p33_p13  ;;  %s124_s30 = sand.u32 1, %s2421_s11  }
  0x16   : > { %s1938_s3 = sshll.u32 %s2425_s12, 5  ;;  %s1865_s4 = sshll.u32 %s124_s30, 6 }
  0x17   : > { %s133_s7 = scalar_lea.hbm %s3548_s0, %s1938_s3  ;;  %s128_s14 = scalar_lea.vmem [#allocation2], %s1865_s4 }
  0x18   : > { %s134_s8 = sshll.u32 %s133_s7, 4  ;;  %s136_s17 = sshll.u32 %s128_s14, 4  ;;  %s135_s8 = int_to_ptr.hbm [resolvable:$true] %s134_s8  ;;  %s137_s17 = int_to_ptr.vmem [resolvable:$true] %s136_s17 }
  0x19   : > { %p2538_p9 = pnand %p1961_p3, %p35_p5  ;;  %s125_s19 = scalar_lea.sflag [#allocation3], %s124_s30 }
  0x1a   : > { %s2325_s21 = sshra.s32 %s135_s8, 4  ;;  %s2332_s26 = scalar_lea.hbm %s3548_s0, 128  ;;  %s2326_s21 = int_to_ptr.hbm [resolvable:$true] %s2325_s21 }
  0x1b   : > { %s2327_s22 = scalar_lea.hbm %s2326_s21, 64  ;;  %p2329_p10 = pneg %p2538_p9 }
  0x1c   : > { %p2328_p2 = scmp.ne.s32.totalorder %s2326_s21, %s2327_s22  ;;  %p2333_p0 = scmp.lt.s32.totalorder %s2326_s21, %s3548_s0 }
  0x1d   : > { %p2334_p3 = scmp.lt.s32.totalorder %s2332_s26, %s2327_s22 }
  0x1e   : > { %p2330_p12 = pnand %p2329_p10, %p2328_p2 }
  0x1f   : > { %p2335_p5 = por %p2334_p3, %p2333_p0 }
  0x20   : > { %p2331_p13 = pneg %p2330_p12 }
  0x22   : > { %p2336_p11 = pnand %p2335_p5, %p2331_p13 }
  0x24   : > { %2339 = shalt.err (!%p2336_p11)
}
  0x25   : > { %s2430_s30 = smov 1024   ;;  %s2431_s4 = smov 512  }
  0x26   : > { %s2432_s5 = smov 32   ;;  %148 = sbr.rel (%p2503_p8) target bundleno = 1070 (0x42e), region = 28 }
  0x27   : > { %1955 = dma.hbm_to_vmem [thread:$0]  (!%p2538_p9), %s135_s8, 1024, %s137_s17, %s125_s19, %s2430_s30, %s2431_s4, %s2432_s5  }
  0x2b   : > { %s2555_s6 = sand.u32 1, %s2417_s10  }
  0x2c   : > { %s1869_s7 = sshll.u32 %s2555_s6, 6  ;;  %s151_s14 = scalar_lea.sflag [#allocation3], %s2555_s6 }
  0x2d   : > { %s2559_s21 = scalar_lea.vmem [#allocation2], %s1869_s7 }
  0x2e   : > { %2400 = dma.done.wait (%p2490_p4), %s151_s14, 1024  }
  0x2f   : > { %2402 = vsyncadd (%p2490_p4), %s151_s14, 4294966272 }
  0x30   : > { %2404 = dma.done.wait (%p40_p1), [#allocation6], 3584  }
  0x31   : > { %2406 = vsyncadd (%p40_p1), [#allocation6], 4294963712  ;;  %v2433_v0 = vmov 3   ;;  %v2434_v1 = vmov 2   ;;  %v198_v2 = vld [vmem:[#allocation5 + $0xa8] sm:$0xff]  ;;  %v196_v3 = vld [vmem:[#allocation5 + $0x38] sm:$0xff] }
  0x32   : > { %2015 = vset.pattern.permute.xlu1 %v2433_v0  ;;  %2014 = vset.pattern.permute.xlu0 %v2434_v1  ;;  %v197_v4 = vld [vmem:[#allocation5 + $0x70] sm:$0xff]  ;;  %v2435_v5 = vmov 0   ;;  %v195_v6 = vld [vmem:[#allocation5] sm:$0xff]  ;;  %v2436_v7 = vmov 1   ;;  %v2580_v15 = vld [vmem:[%s2559_s21 + $0x8] sm:$0xf] }
  0x33   : > { %2017 = vset.pattern.permute.xlu2 %v2434_v1  ;;  %257 = vperm.xlu1 %2015, %v198_v2   ;;  %v1872_v12 = vld [vmem:[%s2559_s21 + $0x20] ss:$8 sm:$0xf]  ;;  %v2600_v25 = vperm.slane %v2580_v15, 0  ;;  %v2621_v37 = vperm.slane %v2580_v15, 1  ;;  %vm420_vm0 = vcmask 261120  }
  0x34   : > { %216 = vperm.xlu0 %2014, %v198_v2   ;;  %206 = vperm.xlu2 %2017, %v196_v3   ;;  %v2577_v14 = vld [vmem:[%s2559_s21] sm:$0xf]  ;;  %v2583_v16 = vld [vmem:[%s2559_s21 + $0x10] sm:$0xf]  ;;  %v2585_v17 = vperm.slane %v1872_v12, 0  ;;  %v2587_v18 = vperm.slane %v1872_v12, 1 }
  0x35   : > { %v2589_v19 = vperm.slane %v1872_v12, 2  ;;  %v2591_v21 = vperm.slane %v1872_v12, 3  ;;  %v2594_v23 = vld [vmem:[%s2559_s21 + $0x18] sm:$0xf]  ;;  %v2597_v24 = vperm.slane %v2577_v14, 0  ;;  %v2603_v26 = vperm.slane %v2583_v16, 0 }
  0x36   : > { %3578 = vst [vmem:[#allocation11_spill] sm:$0xff] %v2585_v17  ;;  %v2609_v30 = vperm.slane %v2594_v23, 0  ;;  %v2618_v36 = vperm.slane %v2577_v14, 1  ;;  %v2624_v38 = vperm.slane %v2583_v16, 1  ;;  %v2627_v39 = vperm.slane %v2594_v23, 1  ;;  %s1871_s15 = sshll.u32 %s2555_s6, 4 }
  0x37   : > { %3579 = vst [vmem:[#allocation12_spill] sm:$0xff] %v2587_v18  ;;  %vm1757_vm5 = vcmask 1043456   ;;  %s180_s20 = scalar_lea.vmem [#allocation7], %s1871_s15  ;;  %s1939_s8 = sshll.u32 %s2481_s13, 4 }
  0x38   : > { %3580 = vst [vmem:[#allocation13_spill] sm:$0xff] %v2589_v19  ;;  %s1776_s19 = scalar_lea.hbm %s3550_s2, %s1939_s8  ;;  %s1778_s22 = sshll.u32 %s180_s20, 4  ;;  %s1779_s22 = int_to_ptr.vmem [resolvable:$true] %s1778_s22 }
  0x39   : > { %3581 = vst [vmem:[#allocation14_spill] sm:$0xff] %v2591_v21  ;;  %s1780_s13 = sshll.u32 %s1776_s19, 4  ;;  %s1765_s24 = scalar_lea.sflag [#allocation4], %s2555_s6  ;;  %s1781_s13 = int_to_ptr.hbm [resolvable:$true] %s1780_s13 }
  0x3a   : > { %s2369_s25 = sshra.s32 %s1781_s13, 4  ;;  %s2375_s30 = scalar_lea.hbm %s3550_s2, 32  ;;  %s2370_s25 = int_to_ptr.hbm [resolvable:$true] %s2369_s25 }
  0x3b   : > { %2016 = vset.pattern.permute.xlu1 %v2435_v5  ;;  %s2371_s26 = scalar_lea.hbm %s2370_s25, 16  ;;  %p2376_p11 = scmp.lt.s32.totalorder %s2370_s25, %s3550_s2 }
  0x3c   : > { %211 = vperm.xlu0 %2014, %v197_v4   ;;  %289 = vperm.xlu1 %2016, %v198_v2   ;;  %p2372_p1 = scmp.ne.s32.totalorder %s2370_s25, %s2371_s26  ;;  %p2377_p9 = scmp.lt.s32.totalorder %s2375_s30, %s2371_s26 }
  0x3d   : > { %2018 = vset.pattern.permute.xlu2 %v2433_v0 }
  0x3e   : > { %253 = vperm.xlu2 %2018, %v197_v4   ;;  %p2373_p4 = pnand %p2372_p1, %p2527_p7  ;;  %p2378_p2 = por %p2377_p9, %p2376_p11 }
  0x40   : > { %p2374_p8 = pneg %p2373_p4 }
  0x42   : > { %p2379_p10 = pnand %p2378_p2, %p2374_p8 }
  0x44   : > { %2019 = vset.pattern.permute.xlu0 %v2435_v5  ;;  %2020 = vset.pattern.permute.xlu1 %v2436_v7 }
  0x45   : > { %285 = vperm.xlu0 %2019, %v197_v4   ;;  %341 = vperm.xlu1 %2020, %v198_v2  }
  0x46   : > { %2021 = vset.pattern.permute.xlu2 %v2434_v1 }
  0x47   : > { %201 = vperm.xlu2 %2021, %v195_v6  }
  0x4d   : > { %2024 = vset.pattern.permute.xlu0 %v2436_v7  ;;  %2022 = vset.pattern.permute.xlu1 %v2433_v0 }
  0x4e   : > { %337 = vperm.xlu0 %2024, %v197_v4   ;;  %249 = vperm.xlu1 %2022, %v196_v3  }
  0x4f   : > { %2023 = vset.pattern.permute.xlu2 %v2435_v5 }
  0x50   : > { %281 = vperm.xlu2 %2023, %v196_v3  }
  0x56   : > { %245 = vperm.xlu1 %2022, %v195_v6  }
  0x58   : > { %277 = vperm.xlu2 %2023, %v195_v6  }
  0x5e   : > { %2025 = vset.pattern.permute.xlu1 %v2436_v7 }
  0x5f   : > { %333 = vperm.xlu1 %2025, %v196_v3  }
  0x60   : > { %2026 = vset.pattern.permute.xlu2 %v2436_v7 }
  0x61   : > { %329 = vperm.xlu2 %2026, %v195_v6  }
  0x8e   : > { %v2569_v8 = vpop.permute.xlu2 %206 }
  0x98   : > { %v2571_v9 = vpop.permute.xlu2 %253 }
  0xa1   : > { %v2574_v13 = vpop.permute.xlu2 %201 }
  0xa5   : > { %v258_v10 = vpop.permute.xlu1 %257 }
  0xa6   : > { %v217_v11 = vpop.permute.xlu0 %216 }
  0xa7   : > { %v240_v27 = vmul.f32 %v2585_v17, %v217_v11  ;;  %v241_v28 = vmul.f32 %v2587_v18, %v217_v11  ;;  %v242_v29 = vmul.f32 %v2589_v19, %v217_v11  ;;  %v243_v31 = vmul.f32 %v2591_v21, %v217_v11 }
  0xa9   : > { %v272_v40 = vadd.f32 %v258_v10, %v240_v27  ;;  %v273_v41 = vadd.f32 %v258_v10, %v241_v28  ;;  %v274_v42 = vadd.f32 %v258_v10, %v242_v29  ;;  %v275_v45 = vadd.f32 %v258_v10, %v243_v31 }
  0xaa   : > { %v2615_v35 = vpop.permute.xlu2 %281 }
  0xae   : > { %v212_v20 = vpop.permute.xlu0 %211  ;;  %v290_v22 = vpop.permute.xlu1 %289 }
  0xaf   : > { %v308_v32 = vmul.f32 %v2597_v24, %v290_v22  ;;  %v309_v33 = vmul.f32 %v2600_v25, %v290_v22  ;;  %v310_v34 = vmul.f32 %v2603_v26, %v290_v22  ;;  %v311_v43 = vmul.f32 %v2609_v30, %v290_v22 }
  0xb0   : > { %v236_v46 = vmul.f32 %v2585_v17, %v212_v20  ;;  %v237_v55 = vmul.f32 %v2587_v18, %v212_v20  ;;  %v238_v56 = vmul.f32 %v2589_v19, %v212_v20  ;;  %v239_v58 = vmul.f32 %v2591_v21, %v212_v20 }
  0xb1   : > { %v324_v48 = vadd.f32 %v308_v32, %v272_v40  ;;  %v325_v49 = vadd.f32 %v309_v33, %v273_v41  ;;  %v326_v50 = vadd.f32 %v310_v34, %v274_v42  ;;  %v327_v57 = vadd.f32 %v311_v43, %v275_v45 }
  0xb2   : > { %v268_v2 = vadd.f32 %v2571_v9, %v236_v46  ;;  %v269_v3 = vadd.f32 %v2571_v9, %v237_v55  ;;  %v270_v4 = vadd.f32 %v2571_v9, %v238_v56  ;;  %v271_v6 = vadd.f32 %v2571_v9, %v239_v58  ;;  %v2646_v7 = vpop.permute.xlu2 %277 }
  0xb3   : > { %v3557_v45 = vmov 32   ;;  %v228_v46 = vmul.f32 %v2585_v17, %v2574_v13  ;;  %v230_v58 = vmul.f32 %v2589_v19, %v2574_v13 }
  0xb4   : > { %2028 = vset.pattern.permute.xlu1 %v3557_v45  ;;  %2027 = vset.pattern.permute.xlu0 %v3557_v45 }
  0xb5   : > { %2029 = vset.pattern.permute.xlu2 %v3557_v45 }
  0xb7   : > { %v286_v44 = vpop.permute.xlu0 %285  ;;  %v342_v47 = vpop.permute.xlu1 %341 }
  0xb8   : > { %v360_v51 = vmul.f32 %v2618_v36, %v342_v47  ;;  %v361_v52 = vmul.f32 %v2621_v37, %v342_v47  ;;  %v362_v53 = vmul.f32 %v2624_v38, %v342_v47  ;;  %v363_v54 = vmul.f32 %v2627_v39, %v342_v47 }
  0xb9   : > { %v304_v62 = vmul.f32 %v2597_v24, %v286_v44  ;;  %v305_v63 = vmul.f32 %v2600_v25, %v286_v44  ;;  %v306_v0 = vmul.f32 %v2603_v26, %v286_v44  ;;  %v307_v5 = vmul.f32 %v2609_v30, %v286_v44 }
  0xba   : > { %v376_v59 = vadd.f32 %v360_v51, %v324_v48  ;;  %v377_v60 = vadd.f32 %v361_v52, %v325_v49  ;;  %v378_v61 = vadd.f32 %v362_v53, %v326_v50  ;;  %v379_v1 = vadd.f32 %v363_v54, %v327_v57  ;;  %v2658_v48 = vld [vmem:[#allocation5 + $0x40] sm:$0xff] }
  0xbb   : > { %v320_v10 = vadd.f32 %v304_v62, %v268_v2  ;;  %v321_v11 = vadd.f32 %v305_v63, %v269_v3  ;;  %v322_v12 = vadd.f32 %v306_v0, %v270_v4  ;;  %v323_v32 = vadd.f32 %v307_v5, %v271_v6  ;;  %v330_v52 = vpop.permute.xlu2 %329  ;;  %407 = vperm.xlu2 %2029, %v2658_v48  }
  0xbc   : > { %2070 = vtanh.f32 %v376_v59  ;;  %v229_v47 = vmul.f32 %v2587_v18, %v2574_v13  ;;  %v232_v49 = vmul.f32 %v2585_v17, %v2569_v8  ;;  %v233_v50 = vmul.f32 %v2587_v18, %v2569_v8 }
  0xbd   : > { %2072 = vtanh.f32 %v377_v60  ;;  %v234_v53 = vmul.f32 %v2589_v19, %v2569_v8  ;;  %v235_v54 = vmul.f32 %v2591_v21, %v2569_v8  ;;  %v231_v59 = vmul.f32 %v2591_v21, %v2574_v13  ;;  %v2685_v13 = vld [vmem:[#allocation5 + $0x78] sm:$0xff] }
  0xbe   : > { %2074 = vtanh.f32 %v378_v61  ;;  %v300_v60 = vmul.f32 %v2597_v24, %v2615_v35  ;;  %v296_v61 = vmul.f32 %v2597_v24, %v2646_v7  ;;  %v301_v63 = vmul.f32 %v2600_v25, %v2615_v35  ;;  %412 = vperm.xlu1 %2028, %v2685_v13  }
  0xbf   : > { %2076 = vtanh.f32 %v379_v1  ;;  %v302_v8 = vmul.f32 %v2603_v26, %v2615_v35  ;;  %v297_v0 = vmul.f32 %v2600_v25, %v2646_v7  ;;  %v348_v1 = vmul.f32 %v2618_v36, %v330_v52 }
  0xc0   : > { %v338_v20 = vpop.permute.xlu0 %337  ;;  %v250_v31 = vpop.permute.xlu1 %249  ;;  %v349_v24 = vmul.f32 %v2621_v37, %v330_v52  ;;  %v303_v25 = vmul.f32 %v2609_v30, %v2615_v35 }
  0xc1   : > { %v356_v22 = vmul.f32 %v2618_v36, %v338_v20  ;;  %v357_v27 = vmul.f32 %v2621_v37, %v338_v20  ;;  %v358_v28 = vmul.f32 %v2624_v38, %v338_v20  ;;  %v359_v29 = vmul.f32 %v2627_v39, %v338_v20 }
  0xc2   : > { %v2071_v33 = vpop.eup %2070  ;;  %v264_v3 = vadd.f32 %v250_v31, %v232_v49  ;;  %v265_v6 = vadd.f32 %v250_v31, %v233_v50  ;;  %v267_v20 = vadd.f32 %v250_v31, %v235_v54 }
  0xc3   : > { %v372_v9 = vadd.f32 %v356_v22, %v320_v10  ;;  %v373_v34 = vadd.f32 %v357_v27, %v321_v11  ;;  %v374_v40 = vadd.f32 %v358_v28, %v322_v12  ;;  %v2073_v41 = vpop.eup %2072  ;;  %441 = vmatpush.msra.mxu0 %v2071_v33  ;;  %v375_v42 = vadd.f32 %v359_v29, %v323_v32 }
  0xc4   : > { %v2075_v43 = vpop.eup %2074  ;;  %470 = vmatpush.msra.mxu1 %v2073_v41  ;;  %v266_v10 = vadd.f32 %v250_v31, %v234_v53  ;;  %v298_v22 = vmul.f32 %v2603_v26, %v2646_v7  ;;  %v316_v28 = vadd.f32 %v300_v60, %v264_v3  ;;  %v299_v29 = vmul.f32 %v2609_v30, %v2646_v7  ;;  %v396_v7 = vld [vmem:[#allocation5 + $0x8] sm:$0xff]  ;;  %v705_v60 = vld [vmem:[#allocation5 + $0xb8] sm:$0xff] }
  0xc5   : > { %2078 = vtanh.f32 %v372_v9  ;;  %v2077_v44 = vpop.eup %2076  ;;  %499 = vmatpush.msra.mxu2 %v2075_v43  ;;  %v350_v32 = vmul.f32 %v2624_v38, %v330_v52  ;;  %v317_v9 = vadd.f32 %v301_v63, %v265_v6  ;;  %v351_v30 = vmul.f32 %v2627_v39, %v330_v52 }
  0xc6   : > { %2080 = vtanh.f32 %v373_v34  ;;  %528 = vmatpush.msra.mxu3 %v2077_v44  ;;  %v318_v34 = vadd.f32 %v302_v8, %v266_v10  ;;  %v319_v44 = vadd.f32 %v303_v25, %v267_v20  ;;  %402 = vperm.xlu1 %2028, %v396_v7   ;;  %v2440_v8 = vmov 35  }
  0xc7   : > { %2082 = vtanh.f32 %v374_v40  ;;  %v3551_v3 = vmov 33  }
  0xc8   : > { %2084 = vtanh.f32 %v375_v42  ;;  %v246_v51 = vpop.permute.xlu1 %245  ;;  %2030 = vset.pattern.permute.xlu2 %v3551_v3 }
  0xc9   : > { %v260_v55 = vadd.f32 %v246_v51, %v228_v46  ;;  %v261_v56 = vadd.f32 %v246_v51, %v229_v47  ;;  %v262_v11 = vadd.f32 %v246_v51, %v230_v58  ;;  %v263_v27 = vadd.f32 %v246_v51, %v231_v59  ;;  %v399_v51 = vld [vmem:[#allocation5 + $0xb0] sm:$0xff] }
  0xca   : > { %417 = vperm.xlu0 %2027, %v399_v51  }
  0xcb   : > { %v2079_v57 = vpop.eup %2078  ;;  %v312_v4 = vadd.f32 %v296_v61, %v260_v55  ;;  %v313_v12 = vadd.f32 %v297_v0, %v261_v56  ;;  %v314_v40 = vadd.f32 %v298_v22, %v262_v11  ;;  %v315_v46 = vadd.f32 %v299_v29, %v263_v27  ;;  %v2747_v22 = vld [vmem:[#allocation5 + $0x48] sm:$0xff] }
  0xcc   : > { %v2081_v62 = vpop.eup %2080  ;;  %442 = vmatpush.msra.mxu0 %v2079_v57  ;;  %v2439_v61 = vmov 34   ;;  %v3552_v0 = vmov 37  }
  0xcd   : > { %v2083_v2 = vpop.eup %2082  ;;  %471 = vmatpush.msra.mxu1 %v2081_v62  ;;  %v364_v33 = vadd.f32 %v348_v1, %v312_v4  ;;  %v365_v42 = vadd.f32 %v349_v24, %v313_v12  ;;  %v2732_v1 = vld [vmem:[#allocation5 + $0x80] sm:$0xff] }
  0xce   : > { %v2085_v5 = vpop.eup %2084  ;;  %500 = vmatpush.msra.mxu2 %v2083_v2 }
  0xcf   : > { %529 = vmatpush.msra.mxu3 %v2085_v5  ;;  %2086 = vtanh.f32 %v364_v33 }
  0xd0   : > { %2088 = vtanh.f32 %v365_v42 }
  0xd1   : > { %v334_v41 = vpop.permute.xlu1 %333 }
  0xd2   : > { %v352_v43 = vmul.f32 %v2618_v36, %v334_v41  ;;  %v353_v35 = vmul.f32 %v2621_v37, %v334_v41  ;;  %v354_v31 = vmul.f32 %v2624_v38, %v334_v41  ;;  %v355_v26 = vmul.f32 %v2627_v39, %v334_v41  ;;  %v2701_v39 = vld [vmem:[#allocation5 + $0x10] sm:$0xff] }
  0xd3   : > { %v366_v36 = vadd.f32 %v350_v32, %v314_v40  ;;  %v367_v37 = vadd.f32 %v351_v30, %v315_v46  ;;  %564 = vperm.xlu0 %2027, %v2701_v39   ;;  %650 = vperm.xlu2 %2030, %v2701_v39  }
  0xd4   : > { %v368_v47 = vadd.f32 %v352_v43, %v316_v28  ;;  %v369_v49 = vadd.f32 %v353_v35, %v317_v9  ;;  %v370_v50 = vadd.f32 %v354_v31, %v318_v34  ;;  %v371_v53 = vadd.f32 %v355_v26, %v319_v44 }
  0xd5   : > { %v2087_v38 = vpop.eup %2086 }
  0xd6   : > { %2090 = vtanh.f32 %v368_v47  ;;  %v2089_v54 = vpop.eup %2088 }
  0xd7   : > { %2092 = vtanh.f32 %v369_v49 }
  0xd8   : > { %2094 = vtanh.f32 %v370_v50 }
  0xd9   : > { %2096 = vtanh.f32 %v371_v53 }
  0xda   : > { %2098 = vtanh.f32 %v366_v36 }
  0xdb   : > { %2100 = vtanh.f32 %v367_v37  ;;  %2036 = vset.pattern.permute.xlu0 %v2440_v8 }
  0xdc   : > { %v2091_v52 = vpop.eup %2090  ;;  %839 = vperm.xlu0 %2036, %v705_v60  }
  0xdd   : > { %v2093_v55 = vpop.eup %2092  ;;  %443 = vmatpush.msra.mxu0 %v2091_v52 }
  0xde   : > { %v2095_v56 = vpop.eup %2094  ;;  %472 = vmatpush.msra.mxu1 %v2093_v55 }
  0xdf   : > { %v2097_v57 = vpop.eup %2096  ;;  %501 = vmatpush.msra.mxu2 %v2095_v56  ;;  %444 = vmatpush.msra.mxu0 %v2087_v38 }
  0xe0   : > { %v2099_v58 = vpop.eup %2098  ;;  %530 = vmatpush.msra.mxu3 %v2097_v57  ;;  %473 = vmatpush.msra.mxu1 %v2089_v54 }
  0xe1   : > { %v2101_v59 = vpop.eup %2100  ;;  %502 = vmatpush.msra.mxu2 %v2099_v58  ;;  %1873 = vmatmul.msk.f32.vlgmr.msra.gmra.mxu0 %vm420_vm0, %v396_v7 }
  0xe2   : > { %531 = vmatpush.msra.mxu3 %v2101_v59  ;;  %1877 = vmatmul.msk.f32.vlgmr.msra.gmra.mxu1 %vm420_vm0, %v396_v7 }
  0xe3   : > { %1881 = vmatmul.msk.f32.vlgmr.msra.gmra.mxu2 %vm420_vm0, %v396_v7  ;;  %1885 = vmatmul.msk.f32.vlgmr.msra.gmra.mxu3 %vm420_vm0, %v396_v7 }
  0xe4   : > { %2037 = vset.pattern.permute.xlu0 %v3552_v0 }
  0xe5   : > { %755 = vperm.xlu0 %2037, %v705_v60  }
  0xe9   : > { %1874 = vmatmul.msk.f32.gmra.mxu0 %vm420_vm0, %v2658_v48 }
  0xea   : > { %1878 = vmatmul.msk.f32.gmra.mxu1 %vm420_vm0, %v2658_v48 }
  0xeb   : > { %1882 = vmatmul.msk.f32.gmra.mxu2 %vm420_vm0, %v2658_v48  ;;  %1886 = vmatmul.msk.f32.gmra.mxu3 %vm420_vm0, %v2658_v48  ;;  %v2438_v48 = vmov 36  }
  0xec   : > { %2031 = vset.pattern.permute.xlu1 %v2438_v48  ;;  %2032 = vset.pattern.permute.xlu2 %v2438_v48 }
  0xed   : > { %723 = vperm.xlu1 %2031, %v705_v60   ;;  %718 = vperm.xlu2 %2032, %v2732_v1  }
  0xee   : > { %743 = vperm.xlu0 %2037, %v2701_v39  }
  0xf1   : > { %1875 = vmatmul.msk.f32.gmra.mxu0 %vm420_vm0, %v2685_v13 }
  0xf2   : > { %1879 = vmatmul.msk.f32.gmra.mxu1 %vm420_vm0, %v2685_v13 }
  0xf3   : > { %1883 = vmatmul.msk.f32.gmra.mxu2 %vm420_vm0, %v2685_v13  ;;  %1887 = vmatmul.msk.f32.gmra.mxu3 %vm420_vm0, %v2685_v13 }
  0xf5   : > { %2033 = vset.pattern.permute.xlu1 %v2439_v61  ;;  %713 = vperm.xlu2 %2032, %v2747_v22  }
  0xf6   : > { %787 = vperm.xlu1 %2033, %v705_v60   ;;  %2044 = vset.pattern.permute.xlu0 %v3557_v45 }
  0xf9   : > { %1876 = vmatmul.msk.f32.gmra.mxu0 %vm420_vm0, %v399_v51 }
  0xfa   : > { %1880 = vmatmul.msk.f32.gmra.mxu1 %vm420_vm0, %v399_v51 }
  0xfb   : > { %1884 = vmatmul.msk.f32.gmra.mxu2 %vm420_vm0, %v399_v51  ;;  %1888 = vmatmul.msk.f32.gmra.mxu3 %vm420_vm0, %v399_v51 }
  0xfd   : > { %2035 = vset.pattern.permute.xlu2 %v2439_v61 }
  0xfe   : > { %2034 = vset.pattern.permute.xlu1 %v3552_v0  ;;  %783 = vperm.xlu2 %2035, %v2732_v1  }
  0xff   : > { %751 = vperm.xlu1 %2034, %v2732_v1  }
 0x106   : > { %2039 = vset.pattern.permute.xlu2 %v3552_v0 }
 0x107   : > { %2038 = vset.pattern.permute.xlu1 %v2438_v48  ;;  %747 = vperm.xlu2 %2039, %v2747_v22  }
 0x108   : > { %708 = vperm.xlu1 %2038, %v2701_v39  }
 0x10f   : > { %2041 = vset.pattern.permute.xlu2 %v2440_v8 }
 0x110   : > { %2040 = vset.pattern.permute.xlu1 %v2439_v61  ;;  %835 = vperm.xlu2 %2041, %v2732_v1   ;;  %v2784_v1 = vld [vmem:[#allocation5 + $0x88] sm:$0xff] }
 0x111   : > { %779 = vperm.xlu1 %2040, %v2747_v22  }
 0x115   : > { %v408_v9 = vpop.permute.xlu2 %407 }
 0x118   : > { %831 = vperm.xlu2 %2041, %v2747_v22   ;;  %v2802_v22 = vld [vmem:[#allocation5 + $0x50] sm:$0xff] }
 0x119   : > { %775 = vperm.xlu1 %2040, %v2701_v39  }
 0x121   : > { %2042 = vset.pattern.permute.xlu1 %v2440_v8 }
 0x122   : > { %827 = vperm.xlu1 %2042, %v2701_v39  }
 0x130   : > { %v413_v12 = vpop.permute.xlu1 %412 }
 0x138   : > { %v403_v42 = vpop.permute.xlu1 %402 }
 0x13c   : > { %v418_v20 = vpop.permute.xlu0 %417 }
 0x15e   : > { %v446_v62 = vpop.f32.mrf.mxu0 }
 0x15f   : > { %v475_v63 = vpop.f32.mrf.mxu1  ;;  %v447_v35 = vadd.f32 %v446_v62, %v403_v42 }
 0x160   : > { %v476_v31 = vadd.f32 %v475_v63, %v403_v42 }
 0x166   : > { %v2734_v13 = vpop.f32.mrf.mxu2  ;;  %v2736_v2 = vpop.f32.mrf.mxu3 }
 0x167   : > { %v449_v4 = vpop.f32.mrf.mxu0  ;;  %v478_v24 = vpop.f32.mrf.mxu1  ;;  %v505_v54 = vadd.f32 %v2734_v13, %v403_v42  ;;  %v534_v55 = vadd.f32 %v2736_v2, %v403_v42 }
 0x168   : > { %v450_v41 = vadd.f32 %v449_v4, %v408_v9  ;;  %v479_v43 = vadd.f32 %v478_v24, %v408_v9  ;;  %v2773_v24 = vld [vmem:[#allocation5 + $0x90] sm:$0xff] }
 0x16e   : > { %v507_v5 = vpop.f32.mrf.mxu2  ;;  %v536_v6 = vpop.f32.mrf.mxu3 }
 0x16f   : > { %v452_v10 = vpop.f32.mrf.mxu0  ;;  %v481_v11 = vpop.f32.mrf.mxu1  ;;  %v508_v53 = vadd.f32 %v507_v5, %v408_v9  ;;  %v537_v37 = vadd.f32 %v536_v6, %v408_v9  ;;  %v2443_v5 = vmov 38   ;;  %v2776_v6 = vld [vmem:[#allocation5 + $0xc8] sm:$0xff] }
 0x170   : > { %v453_v25 = vadd.f32 %v452_v10, %v413_v12  ;;  %v482_v27 = vadd.f32 %v481_v11, %v413_v12  ;;  %2045 = vset.pattern.permute.xlu1 %v2443_v5  ;;  %2043 = vset.pattern.permute.xlu2 %v2443_v5  ;;  %v724_v10 = vpop.permute.xlu1 %723  ;;  %v2792_v11 = vld [vmem:[#allocation5 + $0xc0] sm:$0xff] }
 0x171   : > { %1215 = vperm.xlu1 %2045, %v2773_v24   ;;  %1220 = vperm.xlu2 %2043, %v2776_v6  }
 0x172   : > { %2102 = vtanh.f32 %v453_v25  ;;  %915 = vperm.xlu0 %2044, %v2792_v11   ;;  %v2795_v25 = vld [vmem:[#allocation5 + $0x58] sm:$0xff] }
 0x173   : > { %2104 = vtanh.f32 %v482_v27 }
 0x176   : > { %v510_v28 = vpop.f32.mrf.mxu2  ;;  %v539_v29 = vpop.f32.mrf.mxu3 }
 0x177   : > { %v455_v32 = vpop.f32.mrf.mxu0  ;;  %v484_v33 = vpop.f32.mrf.mxu1  ;;  %v511_v30 = vadd.f32 %v510_v28, %v413_v12  ;;  %v540_v50 = vadd.f32 %v539_v29, %v413_v12  ;;  %v2808_v29 = vld [vmem:[#allocation5 + $0x20] sm:$0xff] }
 0x178   : > { %v456_v34 = vadd.f32 %v455_v32, %v418_v20  ;;  %v485_v40 = vadd.f32 %v484_v33, %v418_v20  ;;  %v2103_v46 = vpop.eup %2102  ;;  %v651_v12 = vpop.permute.xlu2 %650 }
 0x179   : > { %v2105_v49 = vpop.eup %2104  ;;  %2047 = vset.pattern.permute.xlu1 %v2439_v61  ;;  %v653_v32 = vmul.f32 %v651_v12, %v2585_v17  ;;  %v654_v9 = vmul.f32 %v651_v12, %v2587_v18 }
 0x17a   : > { %2106 = vtanh.f32 %v456_v34  ;;  %1284 = vperm.xlu1 %2047, %v2776_v6   ;;  %2049 = vset.pattern.permute.xlu0 %v2443_v5  ;;  %v565_v34 = vpop.permute.xlu0 %564 }
 0x17b   : > { %2108 = vtanh.f32 %v485_v40  ;;  %1210 = vperm.xlu0 %2049, %v2795_v25  }
 0x17c   : > { %2110 = vtanh.f32 %v450_v41 }
 0x17d   : > { %2112 = vtanh.f32 %v479_v43 }
 0x17e   : > { %v513_v26 = vpop.f32.mrf.mxu2  ;;  %v542_v44 = vpop.f32.mrf.mxu3  ;;  %2114 = vtanh.f32 %v447_v35  ;;  %v655_v35 = vmul.f32 %v651_v12, %v2589_v19 }
 0x17f   : > { %v514_v7 = vadd.f32 %v513_v26, %v418_v20  ;;  %v543_v47 = vadd.f32 %v542_v44, %v418_v20  ;;  %2116 = vtanh.f32 %v476_v31  ;;  %v2798_v20 = vpop.permute.xlu1 %787 }
 0x180   : > { %v2107_v51 = vpop.eup %2106  ;;  %v719_v27 = vpop.permute.xlu2 %718 }
 0x181   : > { %2118 = vtanh.f32 %v514_v7  ;;  %v2109_v36 = vpop.eup %2108  ;;  %581 = vmatpush.msrb.mxu0 %v2107_v51  ;;  %v193_v51 = vlaneseq }
 0x182   : > { %2120 = vtanh.f32 %v543_v47  ;;  %v2111_v38 = vpop.eup %2110  ;;  %601 = vmatpush.msrb.mxu1 %v2109_v36  ;;  %v2829_v47 = vpop.permute.xlu0 %839 }
 0x183   : > { %2122 = vtanh.f32 %v511_v30  ;;  %v2113_v52 = vpop.eup %2112  ;;  %582 = vmatpush.msrb.mxu0 %v2103_v46  ;;  %1205 = vperm.xlu0 %2049, %v2808_v29  }
 0x184   : > { %2124 = vtanh.f32 %v540_v50  ;;  %v2115_v56 = vpop.eup %2114  ;;  %602 = vmatpush.msrb.mxu1 %v2105_v49 }
 0x185   : > { %2126 = vtanh.f32 %v508_v53  ;;  %v2117_v57 = vpop.eup %2116  ;;  %583 = vmatpush.msrb.mxu0 %v2111_v38  ;;  %v2833_v53 = vshrl.u32 %v193_v51, 7  ;;  %v738_v38 = vmul.f32 %v724_v10, %v2585_v17 }
 0x186   : > { %2128 = vtanh.f32 %v537_v37  ;;  %603 = vmatpush.msrb.mxu1 %v2113_v52  ;;  %v740_v52 = vmul.f32 %v724_v10, %v2589_v19 }
 0x187   : > { %v2119_v58 = vpop.eup %2118  ;;  %2130 = vtanh.f32 %v505_v54  ;;  %584 = vmatpush.msrb.mxu0 %v2115_v56  ;;  %v2806_v28 = vpop.permute.xlu1 %751  ;;  %3582 = vst [vmem:[#allocation15_spill] sm:$0xff] %v2833_v53  ;;  %v739_v54 = vmul.f32 %v724_v10, %v2587_v18  ;;  %vm694_vm1 = vcmp.lt.s32.totalorder %v2833_v53, 2 }
 0x188   : > { %v2121_v59 = vpop.eup %2120  ;;  %2132 = vtanh.f32 %v534_v55  ;;  %621 = vmatpush.msrb.mxu2 %v2119_v58  ;;  %604 = vmatpush.msrb.mxu1 %v2117_v57  ;;  %v2812_v33 = vpop.permute.xlu2 %713  ;;  %v741_v57 = vmul.f32 %v724_v10, %v2591_v21  ;;  %v734_v58 = vmul.f32 %v719_v27, %v2585_v17 }
 0x189   : > { %v2123_v60 = vpop.eup %2122  ;;  %641 = vmatpush.msrb.mxu3 %v2121_v59  ;;  %1889 = vmatmul.msk.f32.vlgmr.msrb.gmra.mxu0 %vm420_vm0, %v2701_v39  ;;  %2134 = vtanh.f32 %v653_v32  ;;  %v735_v59 = vmul.f32 %v719_v27, %v2587_v18  ;;  %v2853_v10 = vmul.f32 %v2812_v33, %v2587_v18 }
 0x18a   : > { %v2125_v62 = vpop.eup %2124  ;;  %1890 = vmatmul.msk.f32.vlgmr.msrb.gmra.mxu1 %vm420_vm0, %v2701_v39  ;;  %622 = vmatpush.msrb.mxu2 %v2123_v60  ;;  %2136 = vtanh.f32 %v654_v9  ;;  %v736_v60 = vmul.f32 %v719_v27, %v2589_v19 }
 0x18b   : > { %v2127_v63 = vpop.eup %2126  ;;  %642 = vmatpush.msrb.mxu3 %v2125_v62  ;;  %2056 = vset.pattern.permute.xlu0 %v2440_v8  ;;  %2138 = vtanh.f32 %v655_v35 }
 0x18c   : > { %v2129_v13 = vpop.eup %2128  ;;  %623 = vmatpush.msrb.mxu2 %v2127_v63  ;;  %1332 = vperm.xlu0 %2056, %v2773_v24   ;;  %v2878_v51 = vadd.f32 %v2806_v28, %v736_v60 }
 0x18d   : > { %v2131_v2 = vpop.eup %2130  ;;  %643 = vmatpush.msrb.mxu3 %v2129_v13 }
 0x18e   : > { %v2133_v4 = vpop.eup %2132  ;;  %624 = vmatpush.msrb.mxu2 %v2131_v2  ;;  %v737_v2 = vmul.f32 %v719_v27, %v2591_v21  ;;  %v756_v27 = vpop.permute.xlu0 %755 }
 0x18f   : > { %644 = vmatpush.msrb.mxu3 %v2133_v4  ;;  %1891 = vmatmul.msk.f32.vlgmr.msrb.gmra.mxu2 %vm420_vm0, %v2701_v39  ;;  %v2818_v40 = vpop.permute.xlu1 %708  ;;  %v2135_v43 = vpop.eup %2134  ;;  %v730_v4 = vmul.f32 %v2812_v33, %v2585_v17 }
 0x190   : > { %1892 = vmatmul.msk.f32.vlgmr.msrb.gmra.mxu3 %vm420_vm0, %v2701_v39  ;;  %v2444_v39 = vmov 39   ;;  %v2825_v31 = vpop.permute.xlu2 %783  ;;  %v2137_v46 = vpop.eup %2136 }
 0x191   : > { %2046 = vset.pattern.permute.xlu2 %v2444_v39  ;;  %2050 = vset.pattern.permute.xlu1 %v2444_v39  ;;  %v2139_v37 = vpop.eup %2138 }
 0x192   : > { %1252 = vperm.xlu2 %2046, %v2776_v6   ;;  %1248 = vperm.xlu1 %2050, %v2773_v24  }
 0x194   : > { %1328 = vperm.xlu0 %2056, %v2795_v25  }
 0x197   : > { %v2835_v36 = vpop.permute.xlu1 %779 }
 0x198   : > { %v2840_v55 = vpop.permute.xlu2 %747 }
 0x19a   : > { %2048 = vset.pattern.permute.xlu2 %v3557_v45  ;;  %2052 = vset.pattern.permute.xlu1 %v2440_v8  ;;  %v656_v8 = vmul.f32 %v651_v12, %v2591_v21  ;;  %v2849_v12 = vld [vmem:[#allocation5 + $0x18] sm:$0xff] }
 0x19b   : > { %910 = vperm.xlu2 %2048, %v2784_v1   ;;  %1336 = vperm.xlu1 %2052, %v2776_v6  }
 0x19c   : > { %2140 = vtanh.f32 %v656_v8  ;;  %1324 = vperm.xlu0 %2056, %v2808_v29  }
 0x1a2   : > { %v2141_v56 = vpop.eup %2140 }
 0x1a3   : > { %2051 = vset.pattern.permute.xlu2 %v2439_v61  ;;  %2054 = vset.pattern.permute.xlu1 %v2444_v39 }
 0x1a4   : > { %1280 = vperm.xlu2 %2051, %v2773_v24   ;;  %1244 = vperm.xlu1 %2054, %v2795_v25  }
 0x1a5   : > { %2063 = vset.pattern.permute.xlu0 %v2438_v48 }
 0x1a6   : > { %1376 = vperm.xlu0 %2063, %v2808_v29  }
 0x1ac   : > { %2053 = vset.pattern.permute.xlu2 %v3557_v45  ;;  %2057 = vset.pattern.permute.xlu1 %v2438_v48 }
 0x1ad   : > { %1388 = vperm.xlu1 %2057, %v2776_v6   ;;  %905 = vperm.xlu2 %2053, %v2802_v22  }
 0x1ae   : > { %2067 = vset.pattern.permute.xlu0 %v3557_v45 }
 0x1b5   : > { %2059 = vset.pattern.permute.xlu1 %v2444_v39  ;;  %2055 = vset.pattern.permute.xlu2 %v2439_v61 }
 0x1b6   : > { %1240 = vperm.xlu1 %2059, %v2808_v29   ;;  %1276 = vperm.xlu2 %2055, %v2795_v25  }
 0x1be   : > { %2061 = vset.pattern.permute.xlu1 %v2438_v48  ;;  %2058 = vset.pattern.permute.xlu2 %v3557_v45 }
 0x1bf   : > { %1384 = vperm.xlu1 %2061, %v2773_v24   ;;  %900 = vperm.xlu2 %2058, %v2849_v12  }
 0x1c7   : > { %1380 = vperm.xlu1 %2061, %v2795_v25   ;;  %2060 = vset.pattern.permute.xlu2 %v2439_v61 }
 0x1c8   : > { %1272 = vperm.xlu2 %2060, %v2808_v29  }
 0x1cf   : > { %2064 = vset.pattern.permute.xlu1 %v3552_v0 }
 0x1d0   : > { %1432 = vperm.xlu1 %2064, %v2795_v25  }
 0x1d8   : > { %2065 = vset.pattern.permute.xlu1 %v3557_v45 }
 0x206   : > { %v586_v41 = vpop.f32.mrf.mxu0 }
 0x207   : > { %v606_v42 = vpop.f32.mrf.mxu1  ;;  %v587_v26 = vadd.f32 %v586_v41, %v565_v34 }
 0x208   : > { %v607_v44 = vadd.f32 %v606_v42, %v565_v34 }
 0x209   : > { %v661_v30 = vmul.f32 %v2135_v43, %v587_v26  ;;  %v2865_v26 = vmul.f32 %v2812_v33, %v2589_v19 }
 0x20a   : > { %v662_v7 = vmul.f32 %v2137_v46, %v607_v44  ;;  %v2869_v44 = vmul.f32 %v2812_v33, %v2591_v21  ;;  %v766_v46 = vadd.f32 %v2806_v28, %v734_v58  ;;  %v2881_v33 = vadd.f32 %v2806_v28, %v737_v2 }
 0x20b   : > { %v665_v49 = vmul.f32 1.442695, %v661_v30  ;;  %v681_v41 = vrot.slane %v661_v30, 4  ;;  %v767_v30 = vadd.f32 %v2806_v28, %v735_v59  ;;  %v771_v58 = vadd.f32 %v756_v27, %v739_v54 }
 0x20c   : > { %v667_v50 = vmul.f32 1.442695, %v662_v7  ;;  %v682_v43 = vrot.slane %v662_v7, 4  ;;  %v2897_v28 = vadd.f32 %v756_v27, %v740_v52  ;;  %v726_v52 = vmul.f32 %v2818_v40, %v2585_v17 }
 0x20d   : > { %2142 = vpow2.f32 %v665_v49 }
 0x20e   : > { %2144 = vpow2.f32 %v667_v50 }
 0x212   : > { %v626_v62 = vpop.f32.mrf.mxu2 }
 0x213   : > { %v646_v63 = vpop.f32.mrf.mxu3  ;;  %v2143_v13 = vpop.eup %2142  ;;  %v627_v5 = vadd.f32 %v626_v62, %v565_v34 }
 0x214   : > { %v647_v39 = vadd.f32 %v646_v63, %v565_v34  ;;  %v2145_v32 = vpop.eup %2144  ;;  %v673_v9 = vmul.f32 %v2143_v13, %v2577_v14  ;;  %v2895_v62 = vpop.permute.xlu2 %835 }
 0x215   : > { %v674_v42 = vmul.f32 %v2145_v32, %v2580_v15  ;;  %v2859_v35 = vmul.f32 %v2139_v37, %v627_v5  ;;  %v770_v37 = vadd.f32 %v756_v27, %v738_v38  ;;  %v2899_v38 = vadd.f32 %v756_v27, %v741_v57  ;;  %v2902_v63 = vpop.permute.xlu1 %775 }
 0x216   : > { %v2861_v34 = vmul.f32 %v2141_v56, %v647_v39  ;;  %v689_v8 = vadd.f32 %v681_v41, %v673_v9  ;;  %v727_v57 = vmul.f32 %v2818_v40, %v2587_v18  ;;  %v2919_v39 = vmul.f32 %v2818_v40, %v2589_v19 }
 0x217   : > { %v690_v7 = vadd.f32 %v682_v43, %v674_v42  ;;  %v669_v49 = vmul.f32 1.442695, %v2859_v35  ;;  %v2923_v32 = vmul.f32 %v2818_v40, %v2591_v21  ;;  %v762_v27 = vadd.f32 %v2840_v55, %v730_v4 }
 0x218   : > { %v671_v50 = vmul.f32 1.442695, %v2861_v34  ;;  %v2886_v56 = vsel %vm694_vm1, %v2577_v14, %v689_v8  ;;  %v683_v8 = vrot.slane %v2859_v35, 4 }
 0x219   : > { %3583 = vst [vmem:[#allocation16_spill] sm:$0xff] %v2886_v56  ;;  %v2892_v59 = vsel %vm694_vm1, %v2580_v15, %v690_v7  ;;  %v790_v60 = vperm.slane %v2886_v56, 2  ;;  %2146 = vpow2.f32 %v669_v49  ;;  %v842_v15 = vperm.slane %v2886_v56, 3 }
 0x21a   : > { %3584 = vst [vmem:[#allocation17_spill] sm:$0xff] %v2892_v59  ;;  %v791_v14 = vperm.slane %v2892_v59, 2  ;;  %2148 = vpow2.f32 %v671_v50  ;;  %v2908_v13 = vperm.slane %v2892_v59, 3  ;;  %v2934_v50 = vpop.permute.xlu0 %743 }
 0x21b   : > { %v806_v25 = vmul.f32 %v790_v60, %v2798_v20  ;;  %v802_v54 = vmul.f32 %v790_v60, %v2825_v31  ;;  %v854_v7 = vmul.f32 %v842_v15, %v2895_v62  ;;  %v858_v49 = vmul.f32 %v842_v15, %v2829_v47 }
 0x21c   : > { %v807_v2 = vmul.f32 %v791_v14, %v2798_v20  ;;  %v803_v5 = vmul.f32 %v791_v14, %v2825_v31  ;;  %v859_v40 = vmul.f32 %v2908_v13, %v2829_v47  ;;  %v794_v35 = vmul.f32 %v790_v60, %v2902_v63  ;;  %v2949_v59 = vpop.permute.xlu2 %831 }
 0x21d   : > { %v822_v9 = vadd.f32 %v806_v25, %v770_v37  ;;  %v818_v41 = vadd.f32 %v802_v54, %v766_v46  ;;  %v684_v46 = vrot.slane %v2861_v34, 4  ;;  %v855_v48 = vmul.f32 %v2908_v13, %v2895_v62 }
 0x21e   : > { %v823_v42 = vadd.f32 %v807_v2, %v771_v58  ;;  %v819_v43 = vadd.f32 %v803_v5, %v767_v30  ;;  %v798_v30 = vmul.f32 %v790_v60, %v2835_v36  ;;  %v763_v2 = vadd.f32 %v2840_v55, %v2853_v10 }
 0x21f   : > { %v2147_v61 = vpop.eup %2146  ;;  %v870_v58 = vadd.f32 %v854_v7, %v818_v41  ;;  %v874_v25 = vadd.f32 %v858_v49, %v822_v9  ;;  %v758_v0 = vadd.f32 %v2934_v50, %v726_v52  ;;  %v799_v60 = vmul.f32 %v791_v14, %v2835_v36 }
 0x220   : > { %v2149_v4 = vpop.eup %2148  ;;  %v675_v37 = vmul.f32 %v2147_v61, %v2583_v16  ;;  %v875_v54 = vadd.f32 %v859_v40, %v823_v42  ;;  %v871_v5 = vadd.f32 %v855_v48, %v819_v43  ;;  %v795_v56 = vmul.f32 %v791_v14, %v2902_v63  ;;  %v2956_v42 = vpop.permute.xlu1 %827 }
 0x221   : > { %v676_v34 = vmul.f32 %v2149_v4, %v2594_v23  ;;  %2150 = vtanh.f32 %v874_v25  ;;  %v814_v41 = vadd.f32 %v798_v30, %v762_v27  ;;  %v810_v10 = vadd.f32 %v794_v35, %v758_v0 }
 0x222   : > { %v691_v3 = vadd.f32 %v683_v8, %v675_v37  ;;  %2152 = vtanh.f32 %v875_v54  ;;  %v3587_v27 = vmov 37   ;;  %v850_v0 = vmul.f32 %v842_v15, %v2949_v59 }
 0x223   : > { %v692_v61 = vadd.f32 %v684_v46, %v676_v34  ;;  %2154 = vtanh.f32 %v870_v58  ;;  %2062 = vset.pattern.permute.xlu2 %v3587_v27  ;;  %v846_v49 = vmul.f32 %v842_v15, %v2956_v42  ;;  %v765_v40 = vadd.f32 %v2840_v55, %v2869_v44 }
 0x224   : > { %v2954_v9 = vsel %vm694_vm1, %v2583_v16, %v691_v3  ;;  %2156 = vtanh.f32 %v871_v5  ;;  %1440 = vperm.xlu2 %2062, %v2776_v6   ;;  %v764_v3 = vadd.f32 %v2840_v55, %v2865_v26  ;;  %v815_v46 = vadd.f32 %v799_v60, %v763_v2 }
 0x225   : > { %3585 = vst [vmem:[#allocation18_spill] sm:$0xff] %v2954_v9  ;;  %v792_v52 = vperm.slane %v2954_v9, 2  ;;  %v2962_v14 = vsel %vm694_vm1, %v2594_v23, %v692_v61  ;;  %v844_v43 = vperm.slane %v2954_v9, 3  ;;  %v759_v23 = vadd.f32 %v2934_v50, %v727_v57 }
 0x226   : > { %3586 = vst [vmem:[#allocation19_spill] sm:$0xff] %v2962_v14  ;;  %v793_v8 = vperm.slane %v2962_v14, 2  ;;  %v845_v16 = vperm.slane %v2962_v14, 3  ;;  %v866_v30 = vadd.f32 %v850_v0, %v814_v41  ;;  %v862_v37 = vadd.f32 %v846_v49, %v810_v10 }
 0x227   : > { %v808_v7 = vmul.f32 %v792_v52, %v2798_v20  ;;  %v2151_v35 = vpop.eup %2150  ;;  %v811_v48 = vadd.f32 %v795_v56, %v759_v23  ;;  %v860_v26 = vmul.f32 %v844_v43, %v2829_v47  ;;  %v796_v15 = vmul.f32 %v792_v52, %v2902_v63 }
 0x228   : > { %v809_v4 = vmul.f32 %v793_v8, %v2798_v20  ;;  %v2153_v58 = vpop.eup %2152  ;;  %v861_v25 = vmul.f32 %v845_v16, %v2829_v47  ;;  %v800_v55 = vmul.f32 %v792_v52, %v2835_v36  ;;  %938 = vmatpush.msra.mxu0 %v2151_v35  ;;  %v847_v20 = vmul.f32 %v2908_v13, %v2956_v42 }
 0x229   : > { %v824_v6 = vadd.f32 %v808_v7, %v2897_v28  ;;  %v2155_v44 = vpop.eup %2154  ;;  %v801_v56 = vmul.f32 %v793_v8, %v2835_v36  ;;  %v851_v28 = vmul.f32 %v2908_v13, %v2949_v59  ;;  %967 = vmatpush.msra.mxu1 %v2153_v58  ;;  %v761_v47 = vadd.f32 %v2934_v50, %v2923_v32  ;;  %v3024_v58 = vld [vmem:[%s2559_s21 + $0x10] sm:$0xf0] }
 0x22a   : > { %v825_v57 = vadd.f32 %v809_v4, %v2899_v38  ;;  %v2157_v34 = vpop.eup %2156  ;;  %v760_v38 = vadd.f32 %v2934_v50, %v2919_v39  ;;  %2158 = vtanh.f32 %v866_v30  ;;  %939 = vmatpush.msra.mxu0 %v2155_v44  ;;  %v797_v5 = vmul.f32 %v793_v8, %v2902_v63 }
 0x22b   : > { %v876_v54 = vadd.f32 %v860_v26, %v824_v6  ;;  %v863_v60 = vadd.f32 %v847_v20, %v811_v48  ;;  %v867_v61 = vadd.f32 %v851_v28, %v815_v46  ;;  %968 = vmatpush.msra.mxu1 %v2157_v34  ;;  %v804_v36 = vmul.f32 %v792_v52, %v2825_v31  ;;  %v3017_v6 = vpop.permute.xlu1 %1215 }
 0x22c   : > { %v877_v2 = vadd.f32 %v861_v25, %v825_v57  ;;  %v812_v41 = vadd.f32 %v796_v15, %v760_v38  ;;  %2160 = vtanh.f32 %v862_v37  ;;  %v816_v13 = vadd.f32 %v800_v55, %v764_v3  ;;  %1436 = vperm.xlu2 %2062, %v2773_v24   ;;  %v3027_v57 = vld [vmem:[%s2559_s21 + $0x18] sm:$0xf0] }
 0x22d   : > { %v805_v10 = vmul.f32 %v793_v8, %v2825_v31  ;;  %2162 = vtanh.f32 %v876_v54  ;;  %v817_v39 = vadd.f32 %v801_v56, %v765_v40  ;;  %v820_v32 = vadd.f32 %v804_v36, %v2878_v51  ;;  %v3006_v40 = vpop.permute.xlu2 %1220 }
 0x22e   : > { %v856_v50 = vmul.f32 %v844_v43, %v2895_v62  ;;  %2164 = vtanh.f32 %v877_v2  ;;  %v852_v63 = vmul.f32 %v844_v43, %v2949_v59  ;;  %v857_v52 = vmul.f32 %v845_v16, %v2895_v62 }
 0x22f   : > { %v821_v27 = vadd.f32 %v805_v10, %v2881_v33  ;;  %v813_v0 = vadd.f32 %v797_v5, %v761_v47  ;;  %v853_v3 = vmul.f32 %v845_v16, %v2949_v59  ;;  %2166 = vtanh.f32 %v867_v61 }
 0x230   : > { %v872_v31 = vadd.f32 %v856_v50, %v820_v32  ;;  %v2159_v8 = vpop.eup %2158  ;;  %v848_v24 = vmul.f32 %v844_v43, %v2956_v42  ;;  %v868_v7 = vadd.f32 %v852_v63, %v816_v13  ;;  %v849_v51 = vmul.f32 %v845_v16, %v2956_v42 }
 0x231   : > { %v873_v23 = vadd.f32 %v857_v52, %v821_v27  ;;  %2168 = vtanh.f32 %v863_v60  ;;  %v869_v49 = vadd.f32 %v853_v3, %v817_v39  ;;  %940 = vmatpush.msra.mxu0 %v2159_v8  ;;  %v1236_v42 = vmul.f32 %v3006_v40, %v2587_v18  ;;  %v3081_v39 = vpop.permute.xlu0 %915 }
 0x232   : > { %v2161_v33 = vpop.eup %2160  ;;  %v864_v46 = vadd.f32 %v848_v24, %v812_v41  ;;  %2170 = vtanh.f32 %v872_v31  ;;  %v865_v4 = vadd.f32 %v849_v51, %v813_v0  ;;  %v1237_v16 = vmul.f32 %v3006_v40, %v2589_v19  ;;  %v187_v31 = vld [vmem:[%s2559_s21] sm:$0xf0] }
 0x233   : > { %v2163_v62 = vpop.eup %2162  ;;  %941 = vmatpush.msra.mxu0 %v2161_v33  ;;  %2172 = vtanh.f32 %v873_v23  ;;  %v1238_v30 = vmul.f32 %v3006_v40, %v2591_v21  ;;  %v3037_v56 = vperm.slane %v3024_v58, 4  ;;  %v3040_v28 = vperm.slane %v3027_v57, 4  ;;  %v1285_v38 = vpop.permute.xlu1 %1284 }
 0x234   : > { %v2165_v59 = vpop.eup %2164  ;;  %2174 = vtanh.f32 %v868_v7  ;;  %1893 = vmatmul.msk.f32.vlgmr.msra.gmra.mxu0 %vm420_vm0, %v2849_v12  ;;  %996 = vmatpush.msra.mxu2 %v2163_v62  ;;  %v1233_v61 = vmul.f32 %v3017_v6, %v2589_v19  ;;  %v1235_v8 = vmul.f32 %v3006_v40, %v2585_v17  ;;  %v3101_v7 = vperm.slane %v187_v31, 4 }
 0x235   : > { %v2167_v43 = vpop.eup %2166  ;;  %2176 = vtanh.f32 %v869_v49  ;;  %1025 = vmatpush.msra.mxu3 %v2165_v59  ;;  %1428 = vperm.xlu2 %2062, %v2808_v29   ;;  %v3021_v37 = vpop.permute.xlu2 %1252  ;;  %v1305_v47 = vmul.f32 %v3037_v56, %v1285_v38  ;;  %v1306_v2 = vmul.f32 %v3040_v28, %v1285_v38  ;;  %v1231_v51 = vmul.f32 %v3017_v6, %v2585_v17 }
 0x236   : > { %2178 = vtanh.f32 %v864_v46  ;;  %969 = vmatpush.msra.mxu1 %v2167_v43  ;;  %v3030_v25 = vadd.f32 %v3021_v37, %v1236_v42  ;;  %v1269_v55 = vadd.f32 %v3021_v37, %v1237_v16  ;;  %v1270_v44 = vadd.f32 %v3021_v37, %v1238_v30 }
 0x237   : > { %v2169_v35 = vpop.eup %2168  ;;  %2180 = vtanh.f32 %v865_v4  ;;  %v1232_v49 = vmul.f32 %v3017_v6, %v2587_v18  ;;  %v1267_v62 = vadd.f32 %v3021_v37, %v1235_v8  ;;  %v1303_v40 = vmul.f32 %v3101_v7, %v1285_v38 }
 0x238   : > { %v2171_v48 = vpop.eup %2170  ;;  %970 = vmatpush.msra.mxu1 %v2169_v35  ;;  %v3051_v5 = vadd.f32 %v1305_v47, %v1269_v55  ;;  %v3053_v60 = vadd.f32 %v1306_v2, %v1270_v44  ;;  %v3117_v59 = vperm.slane %v187_v31, 5  ;;  %v3125_v16 = vperm.slane %v3024_v58, 5 }
 0x239   : > { %v2173_v26 = vpop.eup %2172  ;;  %1897 = vmatmul.msk.f32.vlgmr.msra.gmra.mxu1 %vm420_vm0, %v2849_v12  ;;  %997 = vmatpush.msra.mxu2 %v2171_v48  ;;  %v1211_v63 = vpop.permute.xlu0 %1210  ;;  %v3128_v30 = vperm.slane %v3027_v57, 5  ;;  %v3201_v53 = vperm.slane %v3024_v58, 7 }
 0x23a   : > { %v2175_v15 = vpop.eup %2174  ;;  %1026 = vmatpush.msra.mxu3 %v2173_v26 }
 0x23b   : > { %v2177_v20 = vpop.eup %2176  ;;  %998 = vmatpush.msra.mxu2 %v2175_v15  ;;  %v1249_v36 = vpop.permute.xlu1 %1248  ;;  %3591 = vst [vmem:[#allocation23_spill] sm:$0xff] %v3201_v53 }
 0x23c   : > { %v2179_v54 = vpop.eup %2178  ;;  %1894 = vmatmul.msk.f32.gmra.mxu0 %vm420_vm0, %v2802_v22  ;;  %1027 = vmatpush.msra.mxu3 %v2177_v20  ;;  %v1265_v41 = vadd.f32 %v1249_v36, %v1233_v61  ;;  %v1263_v48 = vadd.f32 %v1249_v36, %v1231_v51  ;;  %v1264_v26 = vadd.f32 %v1249_v36, %v1232_v49  ;;  %v3143_v61 = vld [vmem:[#allocation5 + $0xd0] sm:$0xff] }
 0x23d   : > { %v2181_v34 = vpop.eup %2180  ;;  %999 = vmatpush.msra.mxu2 %v2179_v54  ;;  %2066 = vset.pattern.permute.xlu2 %v3557_v45  ;;  %v1319_v20 = vadd.f32 %v1303_v40, %v1267_v62  ;;  %3588 = vst [vmem:[#allocation20_spill] sm:$0xff] %v3143_v61  ;;  %v3165_v62 = vperm.slane %v3027_v57, 6 }
 0x23e   : > { %1028 = vmatpush.msra.mxu3 %v2181_v34  ;;  %1901 = vmatmul.msk.f32.vlgmr.msra.gmra.mxu2 %vm420_vm0, %v2849_v12 }
 0x23f   : > { %1905 = vmatmul.msk.f32.vlgmr.msra.gmra.mxu3 %vm420_vm0, %v2849_v12  ;;  %v1234_v12 = vmul.f32 %v3017_v6, %v2591_v21  ;;  %1516 = vperm.xlu1 %2065, %v3143_v61  }
 0x241   : > { %1898 = vmatmul.msk.f32.gmra.mxu1 %vm420_vm0, %v2802_v22  ;;  %v1266_v13 = vadd.f32 %v1249_v36, %v1234_v12  ;;  %v3087_v52 = vpop.permute.xlu0 %1205 }
 0x242   : > { %v1224_v61 = vmul.f32 %v3087_v52, %v2587_v18 }
 0x243   : > { %v1337_v32 = vpop.permute.xlu1 %1336 }
 0x244   : > { %1895 = vmatmul.msk.f32.gmra.mxu0 %vm420_vm0, %v2784_v1  ;;  %v1355_v34 = vmul.f32 %v3117_v59, %v1337_v32  ;;  %v1357_v47 = vmul.f32 %v3125_v16, %v1337_v32  ;;  %v1358_v2 = vmul.f32 %v3128_v30, %v1337_v32 }
 0x246   : > { %1902 = vmatmul.msk.f32.gmra.mxu2 %vm420_vm0, %v2802_v22  ;;  %v1371_v40 = vadd.f32 %v1355_v34, %v1319_v20  ;;  %v1230_v20 = vmul.f32 %v1211_v63, %v2591_v21 }
 0x247   : > { %1906 = vmatmul.msk.f32.gmra.mxu3 %vm420_vm0, %v2802_v22  ;;  %v3079_v22 = vpop.permute.xlu2 %910 }
 0x249   : > { %1899 = vmatmul.msk.f32.gmra.mxu1 %vm420_vm0, %v2784_v1  ;;  %v3099_v24 = vpop.permute.xlu0 %1332 }
 0x24c   : > { %1896 = vmatmul.msk.f32.gmra.mxu0 %vm420_vm0, %v2792_v11 }
 0x24e   : > { %1903 = vmatmul.msk.f32.gmra.mxu2 %vm420_vm0, %v2784_v1 }
 0x24f   : > { %1907 = vmatmul.msk.f32.gmra.mxu3 %vm420_vm0, %v2784_v1  ;;  %v1281_v10 = vpop.permute.xlu2 %1280  ;;  %v3085_v1 = vpop.permute.xlu1 %1244 }
 0x250   : > { %v1299_v35 = vmul.f32 %v3101_v7, %v1281_v10  ;;  %v1301_v37 = vmul.f32 %v3037_v56, %v1281_v10  ;;  %v1302_v15 = vmul.f32 %v3040_v28, %v1281_v10 }
 0x251   : > { %1900 = vmatmul.msk.f32.gmra.mxu1 %vm420_vm0, %v2792_v11  ;;  %v3134_v55 = vpop.permute.xlu0 %1328 }
 0x252   : > { %v3145_v12 = vadd.f32 %v1299_v35, %v1263_v48  ;;  %v3157_v51 = vadd.f32 %v1301_v37, %v1265_v41  ;;  %v3159_v49 = vadd.f32 %v1302_v15, %v1266_v13  ;;  %v1227_v35 = vmul.f32 %v1211_v63, %v2585_v17 }
 0x253   : > { %v3173_v41 = vadd.f32 %v1358_v2, %v3053_v60  ;;  %v1229_v15 = vmul.f32 %v1211_v63, %v2589_v19  ;;  %v3191_v2 = vperm.slane %v187_v31, 7 }
 0x255   : > { %3589 = vst [vmem:[#allocation21_spill] sm:$0xff] %v3173_v41 }
 0x256   : > { %1904 = vmatmul.msk.f32.gmra.mxu2 %vm420_vm0, %v2792_v11 }
 0x257   : > { %1908 = vmatmul.msk.f32.gmra.mxu3 %vm420_vm0, %v2792_v11  ;;  %v3083_v50 = vpop.permute.xlu2 %905  ;;  %v3089_v0 = vpop.permute.xlu1 %1388  ;;  %v3095_v11 = vld [vmem:[%s2559_s21 + $0x8] sm:$0xf0] }
 0x258   : > { %v3104_v23 = vperm.slane %v3095_v11, 4  ;;  %v3120_v43 = vperm.slane %v3095_v11, 5  ;;  %v3152_v8 = vperm.slane %v3095_v11, 6  ;;  %v3198_v14 = vperm.slane %v3095_v11, 7 }
 0x259   : > { %v1261_v11 = vadd.f32 %v3085_v1, %v1229_v15 }
 0x25a   : > { %v1304_v4 = vmul.f32 %v3104_v23, %v1285_v38  ;;  %v1300_v6 = vmul.f32 %v3104_v23, %v1281_v10  ;;  %v1356_v38 = vmul.f32 %v3120_v43, %v1337_v32  ;;  %v3149_v10 = vperm.slane %v187_v31, 6 }
 0x25b   : > { %v3162_v32 = vperm.slane %v3024_v58, 6  ;;  %v1408_v34 = vmul.f32 %v3152_v8, %v3089_v0  ;;  %v1223_v31 = vmul.f32 %v3087_v52, %v2585_v17  ;;  %v3218_v58 = vadd.f32 %v3085_v1, %v1230_v20 }
 0x25c   : > { %v1320_v54 = vadd.f32 %v1304_v4, %v3030_v25  ;;  %v3147_v36 = vadd.f32 %v1300_v6, %v1264_v26  ;;  %v1228_v6 = vmul.f32 %v1211_v63, %v2587_v18  ;;  %v1373_v26 = vadd.f32 %v1357_v47, %v3051_v5 }
 0x25d   : > { %v1409_v47 = vmul.f32 %v3162_v32, %v3089_v0  ;;  %v1259_v63 = vadd.f32 %v3085_v1, %v1227_v35  ;;  %v3212_v35 = vperm.slane %v3027_v57, 7  ;;  %v1225_v17 = vmul.f32 %v3087_v52, %v2589_v19 }
 0x25e   : > { %v1372_v4 = vadd.f32 %v1356_v38, %v1320_v54  ;;  %v1407_v54 = vmul.f32 %v3149_v10, %v3089_v0  ;;  %v1260_v9 = vadd.f32 %v3085_v1, %v1228_v6  ;;  %v3214_v6 = vpop.permute.xlu0 %1324  ;;  %v1226_v57 = vmul.f32 %v3087_v52, %v2591_v21  ;;  %v3232_v1 = vld [vmem:[#allocation5 + $0x28] sm:$0xff] }
 0x25f   : > { %v1277_v27 = vpop.permute.xlu2 %1276  ;;  %v3110_v33 = vpop.permute.xlu1 %1240  ;;  %v3222_v53 = vadd.f32 %v1409_v47, %v1373_v26  ;;  %v1351_v18 = vmul.f32 %v3117_v59, %v3099_v24  ;;  %3595 = vst [vmem:[#allocation27_spill] sm:$0xff] %v3232_v1  ;;  %1501 = vperm.xlu1 %2065, %v3232_v1  }
 0x260   : > { %v1295_v13 = vmul.f32 %v3101_v7, %v1277_v27  ;;  %v1296_v37 = vmul.f32 %v3104_v23, %v1277_v27  ;;  %v1297_v5 = vmul.f32 %v3037_v56, %v1277_v27  ;;  %v3187_v60 = vmul.f32 %v3040_v28, %v1277_v27 }
 0x261   : > { %v3205_v27 = vmul.f32 %v3165_v62, %v3089_v0  ;;  %v1424_v41 = vadd.f32 %v1408_v34, %v1372_v4  ;;  %v1352_v4 = vmul.f32 %v3120_v43, %v3099_v24  ;;  %v1255_v47 = vadd.f32 %v3110_v33, %v1223_v31 }
 0x262   : > { %3590 = vst [vmem:[#allocation22_spill] sm:$0xff] %v3187_v60  ;;  %v1423_v60 = vadd.f32 %v1407_v54, %v1371_v40  ;;  %v1311_v26 = vadd.f32 %v1295_v13, %v1259_v63  ;;  %v1312_v20 = vadd.f32 %v1296_v37, %v1260_v9  ;;  %v1256_v19 = vadd.f32 %v3110_v33, %v1224_v61 }
 0x263   : > { %3592 = vst [vmem:[#allocation24_spill] sm:$0xff] %v3205_v27  ;;  %v1353_v9 = vmul.f32 %v3125_v16, %v3099_v24  ;;  %v1354_v13 = vmul.f32 %v3128_v30, %v3099_v24  ;;  %v3253_v37 = vadd.f32 %v1297_v5, %v1261_v11  ;;  %v1367_v63 = vadd.f32 %v1351_v18, %v3145_v12  ;;  %v3279_v11 = vld [vmem:[#allocation5 + $0x60] sm:$0xff] }
 0x264   : > { %1506 = vperm.xlu0 %2067, %v3279_v11  }
 0x267   : > { %v3091_v3 = vpop.permute.xlu2 %900  ;;  %v3169_v48 = vpop.permute.xlu1 %1384  ;;  %1061 = vperm.xlu1 %2065, %v2808_v29  }
 0x268   : > { %v1403_v61 = vmul.f32 %v3149_v10, %v3169_v48  ;;  %v1404_v24 = vmul.f32 %v3152_v8, %v3169_v48 }
 0x26f   : > { %v3122_v42 = vpop.permute.xlu2 %1272  ;;  %v3238_v54 = vpop.permute.xlu1 %1380 }
 0x270   : > { %v1291_v52 = vmul.f32 %v3101_v7, %v3122_v42  ;;  %v1292_v34 = vmul.f32 %v3104_v23, %v3122_v42  ;;  %v3256_v7 = vadd.f32 %v3110_v33, %v1225_v17  ;;  %v3259_v23 = vadd.f32 %v3110_v33, %v1226_v57 }
 0x271   : > { %v1347_v17 = vmul.f32 %v3117_v59, %v3134_v55  ;;  %v3273_v33 = vmul.f32 %v3037_v56, %v3122_v42  ;;  %v3277_v18 = vmul.f32 %v3040_v28, %v3122_v42  ;;  %v3282_v57 = vadd.f32 %v1353_v9, %v3157_v51 }
 0x272   : > { %v1307_v12 = vadd.f32 %v1291_v52, %v1255_v47  ;;  %v1419_v28 = vadd.f32 %v1403_v61, %v1367_v63  ;;  %v1344_v52 = vmul.f32 %v3120_v43, %v3214_v6 }
 0x27e   : > { %v3183_v38 = vpop.permute.xlu2 %1440 }
 0x27f   : > { %v1459_v40 = vmul.f32 %v3191_v2, %v3183_v38  ;;  %v1460_v21 = vmul.f32 %v3198_v14, %v3183_v38 }
 0x281   : > { %v1475_v1 = vadd.f32 %v1459_v40, %v1423_v60  ;;  %v1308_v60 = vadd.f32 %v1292_v34, %v1256_v19  ;;  %v3285_v40 = vadd.f32 %v1354_v13, %v3159_v49  ;;  %v1343_v19 = vmul.f32 %v3117_v59, %v3214_v6  ;;  %v3300_v34 = vpop.permute.xlu0 %1376 }
 0x282   : > { %v1399_v59 = vmul.f32 %v3149_v10, %v3238_v54  ;;  %v1395_v63 = vmul.f32 %v3149_v10, %v3300_v34 }
 0x283   : > { %2182 = vtanh.f32 %v1475_v1  ;;  %v1359_v13 = vadd.f32 %v1343_v19, %v1307_v12  ;;  %v1360_v61 = vadd.f32 %v1344_v52, %v1308_v60 }
 0x286   : > { %v3267_v5 = vpop.permute.xlu2 %1436 }
 0x287   : > { %v1455_v47 = vmul.f32 %v3191_v2, %v3267_v5 }
 0x289   : > { %v3330_v12 = vpop.eup %2182 }
 0x2b1   : > { %v3112_v46 = vpop.f32.mrf.mxu0 }
 0x2b2   : > { %v944_v9 = vadd.f32 %v3112_v46, %v3091_v3 }
 0x2b6   : > { %v3136_v44 = vpop.f32.mrf.mxu1 }
 0x2b9   : > { %v3154_v25 = vpop.f32.mrf.mxu0 }
 0x2be   : > { %v3193_v45 = vpop.f32.mrf.mxu1 }
 0x2c1   : > { %v949_v0 = vpop.f32.mrf.mxu0  ;;  %v3220_v27 = vpop.f32.mrf.mxu2 }
 0x2c2   : > { %3593 = vst [vmem:[#allocation25_spill] sm:$0xff] %v3220_v27  ;;  %v3230_v15 = vpop.f32.mrf.mxu3 }
 0x2c3   : > { %3594 = vst [vmem:[#allocation26_spill] sm:$0xff] %v3230_v15  ;;  %v1368_v15 = vadd.f32 %v1352_v4, %v3147_v36  ;;  %v1476_v36 = vadd.f32 %v1460_v21, %v1424_v41  ;;  %v1348_v4 = vmul.f32 %v3120_v43, %v3134_v55  ;;  %v950_v21 = vadd.f32 %v949_v0, %v3079_v22 }
 0x2c4   : > { %v1363_v41 = vadd.f32 %v1347_v17, %v1311_v26  ;;  %v947_v0 = vadd.f32 %v3154_v25, %v3083_v50  ;;  %v1400_v43 = vmul.f32 %v3152_v8, %v3238_v54  ;;  %v3313_v26 = vpop.permute.xlu1 %1432  ;;  %v3322_v17 = vpop.permute.xlu2 %1428 }
 0x2c5   : > { %v1420_v49 = vadd.f32 %v1404_v24, %v1368_v15  ;;  %v1456_v15 = vmul.f32 %v3198_v14, %v3267_v5  ;;  %v1364_v1 = vadd.f32 %v1348_v4, %v1312_v20  ;;  %v1396_v24 = vmul.f32 %v3152_v8, %v3300_v34  ;;  %v3325_v4 = vld [vmem:[#allocation5 + $0x98] sm:$0xff] }
 0x2c6   : > { %v978_v31 = vpop.f32.mrf.mxu1  ;;  %v1415_v46 = vadd.f32 %v1399_v59, %v1363_v41  ;;  %v1451_v10 = vmul.f32 %v3191_v2, %v3313_v26  ;;  %1511 = vperm.xlu2 %2066, %v3325_v4   ;;  %v976_v8 = vadd.f32 %v3193_v45, %v3083_v50  ;;  %v1447_v41 = vmul.f32 %v3191_v2, %v3322_v17 }
 0x2c7   : > { %v979_v20 = vadd.f32 %v978_v31, %v3079_v22  ;;  %v1416_v60 = vadd.f32 %v1400_v43, %v1364_v1  ;;  %v1452_v31 = vmul.f32 %v3198_v14, %v3313_v26  ;;  %v973_v59 = vadd.f32 %v3136_v44, %v3091_v3  ;;  %v3596_v43 = vld [vmem:[#allocation23_spill] sm:$0xff] }
 0x2c8   : > { %v1448_v45 = vmul.f32 %v3198_v14, %v3322_v17  ;;  %v1467_v2 = vadd.f32 %v1451_v10, %v1415_v46  ;;  %v1349_v44 = vmul.f32 %v3125_v16, %v3134_v55  ;;  %v1310_v46 = vadd.f32 %v3277_v18, %v3259_v23 }
 0x2c9   : > { %v952_v56 = vpop.f32.mrf.mxu0  ;;  %v3289_v27 = vpop.f32.mrf.mxu2  ;;  %v1462_v23 = vmul.f32 %v3212_v35, %v3183_v38 }
 0x2ca   : > { %v953_v42 = vadd.f32 %v952_v56, %v3081_v39  ;;  %v3296_v51 = vpop.f32.mrf.mxu3  ;;  %v1471_v56 = vadd.f32 %v1455_v47, %v1419_v28  ;;  %v1472_v28 = vadd.f32 %v1456_v15, %v1420_v49  ;;  %v1405_v49 = vmul.f32 %v3162_v32, %v3169_v48 }
 0x2cb   : > { %v1406_v15 = vmul.f32 %v3165_v62, %v3169_v48  ;;  %v1365_v18 = vadd.f32 %v1349_v44, %v3253_v37  ;;  %v1453_v44 = vmul.f32 %v3596_v43, %v3313_v26 }
 0x2cc   : > { %2184 = vtanh.f32 %v953_v42  ;;  %v1411_v42 = vadd.f32 %v1395_v63, %v1359_v13  ;;  %v1468_v13 = vadd.f32 %v1452_v31, %v1416_v60  ;;  %v3597_v63 = vld [vmem:[#allocation21_spill] sm:$0xff] }
 0x2cd   : > { %2186 = vtanh.f32 %v1476_v36  ;;  %v3366_v31 = vadd.f32 %v1406_v15, %v3285_v40 }
 0x2ce   : > { %2188 = vtanh.f32 %v950_v21  ;;  %v981_v25 = vpop.f32.mrf.mxu1 }
 0x2cf   : > { %v982_v36 = vadd.f32 %v981_v25, %v3081_v39  ;;  %2190 = vtanh.f32 %v947_v0  ;;  %v1412_v0 = vadd.f32 %v1396_v24, %v1360_v61  ;;  %v3598_v25 = vld [vmem:[#allocation24_spill] sm:$0xff]  ;;  %v3599_v24 = vld [vmem:[#allocation22_spill] sm:$0xff] }
 0x2d0   : > { %v3354_v61 = vadd.f32 %v3598_v25, %v3597_v63  ;;  %v1314_v48 = vadd.f32 %v3599_v24, %v3218_v58  ;;  %v1350_v58 = vmul.f32 %v3128_v30, %v3134_v55  ;;  %v1401_v55 = vmul.f32 %v3162_v32, %v3238_v54 }
 0x2d1   : > { %2192 = vtanh.f32 %v982_v36  ;;  %v1007_v19 = vpop.f32.mrf.mxu2  ;;  %v1464_v10 = vadd.f32 %v1448_v45, %v1412_v0  ;;  %v1346_v45 = vmul.f32 %v3128_v30, %v3214_v6  ;;  %v1458_v30 = vmul.f32 %v3212_v35, %v3267_v5 }
 0x2d2   : > { %v2185_v21 = vpop.eup %2184  ;;  %2194 = vtanh.f32 %v944_v9  ;;  %v1036_v52 = vpop.f32.mrf.mxu3  ;;  %v1461_v9 = vmul.f32 %v3596_v43, %v3183_v38  ;;  %v1366_v0 = vadd.f32 %v1350_v58, %v1314_v48  ;;  %v1454_v63 = vmul.f32 %v3212_v35, %v3313_v26 }
 0x2d3   : > { %v3338_v47 = vpop.eup %2186  ;;  %2196 = vtanh.f32 %v979_v20  ;;  %1078 = vmatpush.msrb.mxu0 %v2185_v21  ;;  %v1463_v20 = vadd.f32 %v1447_v41, %v1411_v42  ;;  %v3600_v21 = vmov 33   ;;  %v3381_v42 = vld [vmem:[#allocation5 + $0x20] sm:$0xff]  ;;  %v1037_v41 = vadd.f32 %v1036_v52, %v3079_v22 }
 0x2d4   : > { %v2189_v1 = vpop.eup %2188  ;;  %2198 = vtanh.f32 %v1471_v56  ;;  %v1309_v56 = vadd.f32 %v3273_v33, %v3256_v7  ;;  %2068 = vset.pattern.permute.xlu2 %v3600_v21  ;;  %v3374_v33 = vadd.f32 %v1461_v9, %v3222_v53  ;;  %v3602_v9 = vld [vmem:[#allocation26_spill] sm:$0xff]  ;;  %v3603_v25 = vmov 32  }
 0x2d5   : > { %2200 = vtanh.f32 %v976_v8  ;;  %1079 = vmatpush.msrb.mxu0 %v2189_v1  ;;  %v2191_v14 = vpop.eup %2190  ;;  %v3363_v8 = vadd.f32 %v1405_v49, %v3282_v57  ;;  %1147 = vperm.xlu2 %2068, %v2808_v29   ;;  %v1345_v29 = vmul.f32 %v3125_v16, %v3214_v6  ;;  %v1005_v1 = vadd.f32 %v3289_v27, %v3083_v50  ;;  %v3601_v27 = vld [vmem:[#allocation25_spill] sm:$0xff] }
 0x2d6   : > { %2202 = vtanh.f32 %v1472_v28  ;;  %v1008_v28 = vadd.f32 %v1007_v19, %v3079_v22  ;;  %v1457_v16 = vmul.f32 %v3596_v43, %v3267_v5  ;;  %v1402_v22 = vmul.f32 %v3165_v62, %v3238_v54 }
 0x2d7   : > { %v2193_v36 = vpop.eup %2192  ;;  %2204 = vtanh.f32 %v973_v59  ;;  %1080 = vmatpush.msrb.mxu0 %v2191_v14  ;;  %v1417_v6 = vadd.f32 %v1401_v55, %v1365_v18  ;;  %v1002_v52 = vadd.f32 %v3601_v27, %v3091_v3  ;;  %v1397_v54 = vmul.f32 %v3162_v32, %v3300_v34 }
 0x2d8   : > { %v2195_v60 = vpop.eup %2194  ;;  %2206 = vtanh.f32 %v1467_v2  ;;  %1098 = vmatpush.msrb.mxu1 %v2193_v36  ;;  %v1361_v2 = vadd.f32 %v1345_v29, %v1309_v56  ;;  %v1478_v14 = vadd.f32 %v1462_v23, %v3354_v61  ;;  %v1473_v48 = vadd.f32 %v1457_v16, %v3363_v8  ;;  %v1507_v16 = vpop.permute.xlu0 %1506 }
 0x2d9   : > { %v2197_v7 = vpop.eup %2196  ;;  %2208 = vtanh.f32 %v1468_v13  ;;  %1081 = vmatpush.msrb.mxu0 %v2195_v60  ;;  %v1010_v57 = vpop.f32.mrf.mxu2  ;;  %v1398_v13 = vmul.f32 %v3165_v62, %v3300_v34  ;;  %v3604_v62 = vld [vmem:[#allocation27_spill] sm:$0xff]  ;;  %v1469_v36 = vadd.f32 %v1453_v44, %v1417_v6 }
 0x2da   : > { %v2199_v40 = vpop.eup %2198  ;;  %2210 = vtanh.f32 %v1463_v20  ;;  %1099 = vmatpush.msrb.mxu1 %v2197_v7  ;;  %1909 = vmatmul.msk.f32.vlgmr.msrb.gmra.mxu0 %vm420_vm0, %v3381_v42  ;;  %v1011_v53 = vadd.f32 %v1010_v57, %v3081_v39  ;;  %v1039_v38 = vpop.f32.mrf.mxu3  ;;  %v1413_v61 = vadd.f32 %v1397_v54, %v1361_v2  ;;  %v1449_v20 = vmul.f32 %v3596_v43, %v3322_v17 }
 0x2db   : > { %v2201_v37 = vpop.eup %2200  ;;  %2212 = vtanh.f32 %v1464_v10  ;;  %1539 = vmatpush.msra.mxu0 %v3330_v12  ;;  %v1040_v19 = vadd.f32 %v1039_v38, %v3081_v39  ;;  %v1034_v39 = vadd.f32 %v3296_v51, %v3083_v50  ;;  %v1031_v50 = vadd.f32 %v3602_v9, %v3091_v3 }
 0x2dc   : > { %v2203_v59 = vpop.eup %2202  ;;  %1100 = vmatpush.msrb.mxu1 %v2201_v37  ;;  %2214 = vtanh.f32 %v1011_v53  ;;  %v1362_v51 = vadd.f32 %v1346_v45, %v1310_v46  ;;  %v1418_v3 = vadd.f32 %v1402_v22, %v1366_v0  ;;  %v1450_v46 = vmul.f32 %v3212_v35, %v3322_v17 }
 0x2dd   : > { %v2205_v49 = vpop.eup %2204  ;;  %2216 = vtanh.f32 %v1040_v19  ;;  %1540 = vmatpush.msra.mxu0 %v2199_v40  ;;  %2069 = vset.pattern.permute.xlu2 %v3603_v25  ;;  %v1517_v19 = vpop.permute.xlu1 %1516 }
 0x2de   : > { %v2207_v12 = vpop.eup %2206  ;;  %2218 = vtanh.f32 %v1008_v28  ;;  %1101 = vmatpush.msrb.mxu1 %v2205_v49  ;;  %v1414_v56 = vadd.f32 %v1398_v13, %v1362_v51  ;;  %v1470_v60 = vadd.f32 %v1454_v63, %v1418_v3  ;;  %v3605_v28 = vld [vmem:[#allocation20_spill] sm:$0xff] }
 0x2df   : > { %v2209_v15 = vpop.eup %2208  ;;  %2220 = vtanh.f32 %v1037_v41  ;;  %1910 = vmatmul.msk.f32.vlgmr.msrb.gmra.mxu1 %vm420_vm0, %v3381_v42  ;;  %1541 = vmatpush.msra.mxu0 %v2207_v12  ;;  %v3467_v41 = vld [vmem:[#allocation5 + $0x30] sm:$0xf] }
 0x2e0   : > { %v2211_v5 = vpop.eup %2210  ;;  %2222 = vtanh.f32 %v1005_v1  ;;  %1568 = vmatpush.msra.mxu1 %v3338_v47  ;;  %v1474_v47 = vadd.f32 %v1458_v30, %v3366_v31  ;;  %v1465_v31 = vadd.f32 %v1449_v20, %v1413_v61  ;;  %v1466_v35 = vadd.f32 %v1450_v46, %v1414_v56  ;;  %1662 = vperm.xlu2 %2069, %v3467_v41  }
 0x2e1   : > { %v2213_v32 = vpop.eup %2212  ;;  %2224 = vtanh.f32 %v1034_v39  ;;  %1542 = vmatpush.msra.mxu0 %v2211_v5 }
 0x2e2   : > { %v2215_v24 = vpop.eup %2214  ;;  %2226 = vtanh.f32 %v1002_v52  ;;  %1569 = vmatpush.msra.mxu1 %v2203_v59  ;;  %1913 = vmatmul.msk.f32.vlgmr.msra.gmra.mxu0 %vm420_vm0, %v3604_v62 }
 0x2e3   : > { %v2217_v34 = vpop.eup %2216  ;;  %2228 = vtanh.f32 %v1031_v50  ;;  %1118 = vmatpush.msrb.mxu2 %v2215_v24 }
 0x2e4   : > { %v2219_v26 = vpop.eup %2218  ;;  %2230 = vtanh.f32 %v3374_v33  ;;  %1570 = vmatpush.msra.mxu1 %v2209_v15  ;;  %1138 = vmatpush.msrb.mxu3 %v2217_v34 }
 0x2e5   : > { %v2221_v10 = vpop.eup %2220  ;;  %2232 = vtanh.f32 %v1478_v14  ;;  %1119 = vmatpush.msrb.mxu2 %v2219_v26  ;;  %v1502_v30 = vpop.permute.xlu1 %1501 }
 0x2e6   : > { %v2223_v8 = vpop.eup %2222  ;;  %2234 = vtanh.f32 %v1473_v48  ;;  %1571 = vmatpush.msra.mxu1 %v2213_v32  ;;  %1139 = vmatpush.msrb.mxu3 %v2221_v10 }
 0x2e7   : > { %v2225_v43 = vpop.eup %2224  ;;  %2236 = vtanh.f32 %v1474_v47  ;;  %1917 = vmatmul.msk.f32.vlgmr.msra.gmra.mxu1 %vm420_vm0, %v3604_v62  ;;  %1120 = vmatpush.msrb.mxu2 %v2223_v8 }
 0x2e8   : > { %v2227_v58 = vpop.eup %2226  ;;  %2238 = vtanh.f32 %v1469_v36  ;;  %1140 = vmatpush.msrb.mxu3 %v2225_v43 }
 0x2e9   : > { %v2229_v17 = vpop.eup %2228  ;;  %2240 = vtanh.f32 %v1470_v60  ;;  %1121 = vmatpush.msrb.mxu2 %v2227_v58 }
 0x2ea   : > { %v2231_v21 = vpop.eup %2230  ;;  %1914 = vmatmul.msk.f32.gmra.mxu0 %vm420_vm0, %v3279_v11  ;;  %1141 = vmatpush.msrb.mxu3 %v2229_v17  ;;  %2242 = vtanh.f32 %v1465_v31 }
 0x2eb   : > { %v2233_v7 = vpop.eup %2232  ;;  %1911 = vmatmul.msk.f32.vlgmr.msrb.gmra.mxu2 %vm420_vm0, %v3381_v42  ;;  %1912 = vmatmul.msk.f32.vlgmr.msrb.gmra.mxu3 %vm420_vm0, %v3381_v42  ;;  %2244 = vtanh.f32 %v1466_v35 }
 0x2ec   : > { %v2235_v23 = vpop.eup %2234  ;;  %1597 = vmatpush.msra.mxu2 %v2231_v21  ;;  %1626 = vmatpush.msra.mxu3 %v2233_v7 }
 0x2ed   : > { %v2237_v33 = vpop.eup %2236 }
 0x2ee   : > { %v2239_v18 = vpop.eup %2238  ;;  %1598 = vmatpush.msra.mxu2 %v2235_v23  ;;  %1627 = vmatpush.msra.mxu3 %v2237_v33  ;;  %v3606_v33 = vld [vmem:[#allocation12_spill] sm:$0xff] }
 0x2ef   : > { %v2241_v57 = vpop.eup %2240  ;;  %1918 = vmatmul.msk.f32.gmra.mxu1 %vm420_vm0, %v3279_v11 }
 0x2f0   : > { %1599 = vmatpush.msra.mxu2 %v2239_v18  ;;  %1628 = vmatpush.msra.mxu3 %v2241_v57  ;;  %v2243_v40 = vpop.eup %2242  ;;  %v3607_v57 = vld [vmem:[#allocation11_spill] sm:$0xff] }
 0x2f1   : > { %v2245_v55 = vpop.eup %2244 }
 0x2f2   : > { %1915 = vmatmul.msk.f32.gmra.mxu0 %vm420_vm0, %v3325_v4  ;;  %1600 = vmatpush.msra.mxu2 %v2243_v40 }
 0x2f3   : > { %1629 = vmatpush.msra.mxu3 %v2245_v55  ;;  %1921 = vmatmul.msk.f32.vlgmr.msra.gmra.mxu2 %vm420_vm0, %v3604_v62  ;;  %v1062_v55 = vpop.permute.xlu1 %1061 }
 0x2f4   : > { %1925 = vmatmul.msk.f32.vlgmr.msra.gmra.mxu3 %vm420_vm0, %v3604_v62 }
 0x2f7   : > { %1919 = vmatmul.msk.f32.gmra.mxu1 %vm420_vm0, %v3325_v4 }
 0x2fa   : > { %1916 = vmatmul.msk.f32.gmra.mxu0 %vm420_vm0, %v3605_v28 }
 0x2fb   : > { %1922 = vmatmul.msk.f32.gmra.mxu2 %vm420_vm0, %v3279_v11 }
 0x2fc   : > { %1926 = vmatmul.msk.f32.gmra.mxu3 %vm420_vm0, %v3279_v11 }
 0x2ff   : > { %1920 = vmatmul.msk.f32.gmra.mxu1 %vm420_vm0, %v3605_v28 }
 0x303   : > { %1923 = vmatmul.msk.f32.gmra.mxu2 %vm420_vm0, %v3325_v4 }
 0x304   : > { %1927 = vmatmul.msk.f32.gmra.mxu3 %vm420_vm0, %v3325_v4 }
 0x30b   : > { %1924 = vmatmul.msk.f32.gmra.mxu2 %vm420_vm0, %v3605_v28 }
 0x30c   : > { %1928 = vmatmul.msk.f32.gmra.mxu3 %vm420_vm0, %v3605_v28 }
 0x320   : > { %v1512_v45 = vpop.permute.xlu2 %1511 }
 0x32f   : > { %v1148_v23 = vpop.permute.xlu2 %1147 }
 0x330   : > { %v1151_v18 = vmul.f32 %v1148_v23, %v3606_v33  ;;  %v1150_v40 = vmul.f32 %v1148_v23, %v3607_v57 }
 0x357   : > { %v3463_v42 = vpop.f32.mrf.mxu0 }
 0x35c   : > { %v3465_v53 = vpop.f32.mrf.mxu1 }
 0x35d   : > { %v1104_v28 = vadd.f32 %v3465_v53, %v1062_v55 }
 0x35f   : > { %v1544_v11 = vpop.f32.mrf.mxu0 }
 0x360   : > { %v1545_v52 = vadd.f32 %v1544_v11, %v1502_v30 }
 0x364   : > { %v1573_v38 = vpop.f32.mrf.mxu1 }
 0x365   : > { %v1574_v51 = vadd.f32 %v1573_v38, %v1502_v30  ;;  %v1084_v38 = vadd.f32 %v3463_v42, %v1062_v55 }
 0x367   : > { %v1547_v37 = vpop.f32.mrf.mxu0 }
 0x368   : > { %v1548_v27 = vadd.f32 %v1547_v37, %v1507_v16 }
 0x36c   : > { %v1576_v29 = vpop.f32.mrf.mxu1 }
 0x36d   : > { %v1577_v9 = vadd.f32 %v1576_v29, %v1507_v16 }
 0x36e   : > { %v3470_v4 = vpop.f32.mrf.mxu2  ;;  %v3472_v59 = vpop.f32.mrf.mxu3 }
 0x36f   : > { %v1550_v0 = vpop.f32.mrf.mxu0 }
 0x370   : > { %v1551_v49 = vadd.f32 %v1550_v0, %v1512_v45 }
 0x372   : > { %2246 = vtanh.f32 %v1551_v49 }
 0x374   : > { %v1579_v1 = vpop.f32.mrf.mxu1 }
 0x375   : > { %v1580_v15 = vadd.f32 %v1579_v1, %v1512_v45 }
 0x376   : > { %v1602_v22 = vpop.f32.mrf.mxu2 }
 0x377   : > { %v1553_v39 = vpop.f32.mrf.mxu0  ;;  %v1631_v12 = vpop.f32.mrf.mxu3  ;;  %v1603_v10 = vadd.f32 %v1602_v22, %v1502_v30 }
 0x378   : > { %v1554_v6 = vadd.f32 %v1553_v39, %v1517_v19  ;;  %v2247_v5 = vpop.eup %2246  ;;  %v1632_v60 = vadd.f32 %v1631_v12, %v1502_v30  ;;  %v3610_v12 = vld [vmem:[#allocation17_spill] sm:$0xff] }
 0x37a   : > { %2248 = vtanh.f32 %v1554_v6  ;;  %v3611_v6 = vld [vmem:[#allocation16_spill] sm:$0xff] }
 0x37b   : > { %2250 = vtanh.f32 %v1548_v27 }
 0x37c   : > { %v1582_v2 = vpop.f32.mrf.mxu1  ;;  %2252 = vtanh.f32 %v1545_v52  ;;  %v3612_v52 = vld [vmem:[#allocation15_spill] sm:$0xff] }
 0x37d   : > { %v1583_v54 = vadd.f32 %v1582_v2, %v1517_v19  ;;  %2254 = vtanh.f32 %v1580_v15  ;;  %vm1190_vm2 = vcmp.ge.s32.totalorder %v3612_v52, 2  ;;  %vm1191_vm3 = vcmp.lt.s32.totalorder %v3612_v52, 4 }
 0x37e   : > { %v1605_v50 = vpop.f32.mrf.mxu2  ;;  %v1144_v2 = vadd.f32 %v3472_v59, %v1062_v55  ;;  %vm3493_vm4 = vmand %vm1190_vm2, %vm1191_vm3 }
 0x37f   : > { %2256 = vtanh.f32 %v1583_v54  ;;  %v1634_v44 = vpop.f32.mrf.mxu3  ;;  %v1606_v56 = vadd.f32 %v1605_v50, %v1507_v16  ;;  %v1663_v54 = vpop.permute.xlu2 %1662 }
 0x380   : > { %v2249_v13 = vpop.eup %2248  ;;  %2258 = vtanh.f32 %v1577_v9  ;;  %v1635_v46 = vadd.f32 %v1634_v44, %v1507_v16  ;;  %v3609_v16 = vld [vmem:[#allocation13_spill] sm:$0xff]  ;;  %v1124_v44 = vadd.f32 %v3470_v4, %v1062_v55 }
 0x381   : > { %1679 = vmatpush.msrb.mxu0 %v2249_v13  ;;  %v2251_v32 = vpop.eup %2250  ;;  %2260 = vtanh.f32 %v1574_v51  ;;  %v1152_v22 = vmul.f32 %v1148_v23, %v3609_v16 }
 0x382   : > { %v2253_v14 = vpop.eup %2252 }
 0x383   : > { %1680 = vmatpush.msrb.mxu0 %v2247_v5  ;;  %v2255_v3 = vpop.eup %2254 }
 0x385   : > { %v2257_v63 = vpop.eup %2256  ;;  %1681 = vmatpush.msrb.mxu0 %v2251_v32 }
 0x386   : > { %1699 = vmatpush.msrb.mxu1 %v2257_v63  ;;  %v1608_v25 = vpop.f32.mrf.mxu2  ;;  %v2259_v24 = vpop.eup %2258 }
 0x387   : > { %v1637_v48 = vpop.f32.mrf.mxu3  ;;  %1682 = vmatpush.msrb.mxu0 %v2253_v14  ;;  %v2261_v62 = vpop.eup %2260  ;;  %v1609_v47 = vadd.f32 %v1608_v25, %v1512_v45 }
 0x388   : > { %1700 = vmatpush.msrb.mxu1 %v2255_v3  ;;  %1929 = vmatmul.msk.f32.vlgmr.msrb.gmra.mxu0 %vm420_vm0, %v3467_v41  ;;  %v1638_v26 = vadd.f32 %v1637_v48, %v1512_v45 }
 0x38a   : > { %1701 = vmatpush.msrb.mxu1 %v2259_v24 }
 0x38c   : > { %1702 = vmatpush.msrb.mxu1 %v2261_v62 }
 0x38d   : > { %1930 = vmatmul.msk.f32.vlgmr.msrb.gmra.mxu1 %vm420_vm0, %v3467_v41 }
 0x38e   : > { %v1611_v34 = vpop.f32.mrf.mxu2 }
 0x38f   : > { %v1612_v61 = vadd.f32 %v1611_v34, %v1517_v19  ;;  %v1640_v20 = vpop.f32.mrf.mxu3 }
 0x390   : > { %v1641_v36 = vadd.f32 %v1640_v20, %v1517_v19 }
 0x391   : > { %2262 = vtanh.f32 %v1612_v61 }
 0x392   : > { %2264 = vtanh.f32 %v1641_v36  ;;  %v3615_v36 = vld [vmem:[#allocation19_spill] sm:$0xff] }
 0x393   : > { %2266 = vtanh.f32 %v1609_v47 }
 0x394   : > { %2268 = vtanh.f32 %v1638_v26 }
 0x395   : > { %2270 = vtanh.f32 %v1606_v56 }
 0x396   : > { %2272 = vtanh.f32 %v1635_v46  ;;  %v3616_v46 = vld [vmem:[#allocation18_spill] sm:$0xff] }
 0x397   : > { %v2263_v8 = vpop.eup %2262  ;;  %2274 = vtanh.f32 %v1603_v10 }
 0x398   : > { %v2265_v43 = vpop.eup %2264  ;;  %2276 = vtanh.f32 %v1632_v60  ;;  %1719 = vmatpush.msrb.mxu2 %v2263_v8 }
 0x399   : > { %v2267_v31 = vpop.eup %2266  ;;  %1739 = vmatpush.msrb.mxu3 %v2265_v43  ;;  %2278 = vtanh.f32 %v1151_v18 }
 0x39a   : > { %v2269_v58 = vpop.eup %2268  ;;  %1720 = vmatpush.msrb.mxu2 %v2267_v31  ;;  %2280 = vtanh.f32 %v1150_v40 }
 0x39b   : > { %v2271_v35 = vpop.eup %2270  ;;  %1740 = vmatpush.msrb.mxu3 %v2269_v58 }
 0x39c   : > { %v2273_v17 = vpop.eup %2272  ;;  %1721 = vmatpush.msrb.mxu2 %v2271_v35 }
 0x39d   : > { %v2275_v21 = vpop.eup %2274  ;;  %1741 = vmatpush.msrb.mxu3 %v2273_v17 }
 0x39e   : > { %v2277_v7 = vpop.eup %2276  ;;  %1722 = vmatpush.msrb.mxu2 %v2275_v21 }
 0x39f   : > { %1742 = vmatpush.msrb.mxu3 %v2277_v7  ;;  %1931 = vmatmul.msk.f32.vlgmr.msrb.gmra.mxu2 %vm420_vm0, %v3467_v41  ;;  %v2279_v11 = vpop.eup %2278 }
 0x3a0   : > { %1932 = vmatmul.msk.f32.vlgmr.msrb.gmra.mxu3 %vm420_vm0, %v3467_v41  ;;  %v2281_v37 = vpop.eup %2280  ;;  %v1159_v29 = vmul.f32 %v2279_v11, %v1104_v28  ;;  %v3608_v41 = vld [vmem:[#allocation14_spill] sm:$0xff] }
 0x3a1   : > { %v1158_v19 = vmul.f32 %v2281_v37, %v1084_v38  ;;  %v1153_v1 = vmul.f32 %v1148_v23, %v3608_v41 }
 0x3a2   : > { %v1164_v0 = vmul.f32 1.442695, %v1159_v29  ;;  %v1179_v53 = vrot.slane %v1159_v29, 4 }
 0x3a3   : > { %v1162_v45 = vmul.f32 1.442695, %v1158_v19  ;;  %v1178_v27 = vrot.slane %v1158_v19, 4 }
 0x3a4   : > { %2282 = vpow2.f32 %v1164_v0 }
 0x3a5   : > { %2284 = vpow2.f32 %v1162_v45 }
 0x3a6   : > { %2286 = vtanh.f32 %v1153_v1 }
 0x3a7   : > { %2288 = vtanh.f32 %v1152_v22 }
 0x3aa   : > { %v2283_v49 = vpop.eup %2282 }
 0x3ab   : > { %v2285_v39 = vpop.eup %2284  ;;  %v1171_v30 = vmul.f32 %v2283_v49, %v3610_v12 }
 0x3ac   : > { %v1170_v42 = vmul.f32 %v2285_v39, %v3611_v6  ;;  %v2287_v50 = vpop.eup %2286 }
 0x3ad   : > { %v1187_v15 = vadd.f32 %v1179_v53, %v1171_v30  ;;  %v2289_v32 = vpop.eup %2288  ;;  %v1161_v63 = vmul.f32 %v2287_v50, %v1144_v2 }
 0x3ae   : > { %v1186_v51 = vadd.f32 %v1178_v27, %v1170_v42  ;;  %v1160_v24 = vmul.f32 %v2289_v32, %v1124_v44 }
 0x3af   : > { %v1196_v25 = vsel %vm3493_vm4, %v3610_v12, %v1187_v15  ;;  %v1168_v34 = vmul.f32 1.442695, %v1161_v63  ;;  %v1181_v60 = vrot.slane %v1161_v63, 4 }
 0x3b0   : > { %v1195_v48 = vsel %vm3493_vm4, %v3611_v6, %v1186_v51  ;;  %v1166_v61 = vmul.f32 1.442695, %v1160_v24  ;;  %v1180_v8 = vrot.slane %v1160_v24, 4 }
 0x3b1   : > { %2290 = vpow2.f32 %v1168_v34 }
 0x3b2   : > { %2292 = vpow2.f32 %v1166_v61 }
 0x3b7   : > { %v2291_v20 = vpop.eup %2290 }
 0x3b8   : > { %v2293_v26 = vpop.eup %2292  ;;  %v1173_v56 = vmul.f32 %v2291_v20, %v3615_v36 }
 0x3b9   : > { %v1172_v10 = vmul.f32 %v2293_v26, %v3616_v46 }
 0x3ba   : > { %v1189_v43 = vadd.f32 %v1181_v60, %v1173_v56 }
 0x3bb   : > { %v1188_v58 = vadd.f32 %v1180_v8, %v1172_v10 }
 0x3bc   : > { %v1198_v7 = vsel %vm3493_vm4, %v3615_v36, %v1189_v43 }
 0x3bd   : > { %v1197_v33 = vsel %vm3493_vm4, %v3616_v46, %v1188_v58 }
 0x405   : > { %v1684_v9 = vpop.f32.mrf.mxu0 }
 0x406   : > { %v1685_v14 = vadd.f32 %v1684_v9, %v1663_v54 }
 0x408   : > { %v1747_v62 = vadd.f32 %v1685_v14, %v1195_v48 }
 0x40a   : > { %v1704_v13 = vpop.f32.mrf.mxu1 }
 0x40b   : > { %v1705_v3 = vadd.f32 %v1704_v13, %v1663_v54 }
 0x40d   : > { %v1748_v59 = vadd.f32 %v1705_v3, %v1196_v25 }
 0x40f   : > { %v1755_v4 = vrot.slane %v1748_v59, 4 }
 0x411   : > { %v1758_v47 = vsel %vm1757_vm5, %v1747_v62, %v1755_v4 }
 0x412   : > { %1762 = vst [vmem:[%s180_s20] sm:$0xff] %v1758_v47 }
 0x422   : > { %v1724_v31 = vpop.f32.mrf.mxu2 }
 0x423   : > { %v1744_v35 = vpop.f32.mrf.mxu3  ;;  %v1725_v17 = vadd.f32 %v1724_v31, %v1663_v54 }
 0x424   : > { %v1745_v21 = vadd.f32 %v1744_v35, %v1663_v54 }
 0x425   : > { %v1749_v18 = vadd.f32 %v1725_v17, %v1197_v33 }
 0x426   : > { %v1750_v23 = vadd.f32 %v1745_v21, %v1198_v7 }
 0x428   : > { %v1756_v57 = vrot.slane %v1750_v23, 4 }
 0x42a   : > { %v1759_v40 = vsel %vm1757_vm5, %v1749_v18, %v1756_v57 }
 0x42b   : > { %1763 = vst [vmem:[%s180_s20 + $0x8] sm:$0xff] %v1759_v40 }
 0x42c   : > { %2382 = shalt.err (!%p2379_p10)
}
 0x42d   : > { %1946 = dma.vmem_to_hbm [thread:$0]  (%p2527_p7), %s1779_s22, 256, %s1781_s13, %s1765_s24  }
 0x42e PF: > { %s1792_s6 = sand.u32 1, %s2413_s9   ;;  %p3617_p12 = scmp.ge.s32.totalorder %s2425_s12, 2 }
 0x42f   : > { %s1793_s7 = scalar_lea.sflag [#allocation4], %s1792_s6 }
 0x430   : > { %p1957_p13 = pnand %p3617_p12, %p2495_p6 }
 0x432   : > { %p1958_p0 = pneg %p1957_p13 }
 0x434   : > { %2408 = dma.done.wait (%p1958_p0), %s1793_s7, 256  }
 0x435   : > { %2410 = vsyncadd (%p1958_p0), %s1793_s7, 4294967040  ;;  %p16_p3 = scmp.ge.s32.totalorder %s2513_s23, 4   ;;  %s3618_s9 = smov %s2417_s10 }
 0x436   : > { %s3619_s10 = smov %s2421_s11  ;;  %s3620_s11 = smov %s2523_s28 }
 0x437   : > { %s3621_s12 = smov %s2513_s23  ;;  %18 = sbr.rel (!%p16_p3) target bundleno = 6 (0x6), region = 78 }
 0x43c   :  { %1799 = vsyncpa [#allocation3], 1 }
 0x43d   :  { %1801 = vsyncpa [#allocation3 + $0x1], 1 }
 0x43e   :  { %1802 = vsyncpa [#allocation6], 1 }
 0x43f   :  { %1803 = vsyncpa [#allocation4], 1 }
 0x440   :  { %1805 = vsyncpa [#allocation4 + $0x1], 1 }

</bundles_post_ra>
